<compile_context>
chip_gen: v5e
topology: v5e:2x2
jax: 0.10.0
libtpu: 0.0.40
codegen_flags: <defaults>
</compile_context>

<pallas_src>
import functools
import math

import jax
import jax.numpy as jnp
from jax.experimental import pallas as pl
from jax.experimental.pallas import tpu as pltpu


def _fast_sigmoid(x):
    # sigmoid(x) == 0.5 * (tanh(x/2) + 1): single EUP op on the serial path.
    return 0.5 * (jnp.tanh(0.5 * x) + 1.0)


# ---------------------------------------------------------------------------
# Fused kernel: stacked GRU + FC + sigmoid, single invocation (no grid).
# ---------------------------------------------------------------------------
def _generator_kernel(*args, T, B, H, L, apply_sigmoid):
    # args = (x, [w_ih, w_hh, b_a, b_hn] * L, fc_w, fc_b, o_ref)
    x_ref = args[0]
    fc_w_ref = args[1 + 4 * L]
    fc_b_ref = args[2 + 4 * L]
    o_ref = args[3 + 4 * L]

    layer_in = x_ref[...]                       # (T*B, D_in) bf16

    for l in range(L):                          # static unroll over layers
        w_ih = args[1 + 4 * l][...]             # (D_in, 3H) bf16, gates [r|z|n]
        w_hh = args[2 + 4 * l][...]             # (H,   3H)  bf16, gates [r|z|n]
        b_a = args[3 + 4 * l][...]              # (1, 3H) f32 = [bi_r+bh_r, bi_z+bh_z, bi_n]
        b_hn = args[4 + 4 * l][...]             # (1, H)  f32 (stays inside r-gated term)

        # Input projections for ALL time steps: ONE matmul, off the serial path.
        a_all = (jnp.dot(layer_in, w_ih, preferred_element_type=jnp.float32)
                 + b_a)                          # (T*B, 3H) f32

        # Hoisted broadcast (JAX does not CSE broadcast_in_dim inside loops).
        b_hn_b = jnp.broadcast_to(b_hn, (B, H))

        # Recurrence: one fused (B, H) @ (H, 3H) MXU push per step.
        h = jnp.zeros((B, H), jnp.float32)
        hs = []
        for t in range(T):                       # static unroll over time
            lo = t * B                           # B is a multiple of 8 -> aligned
            a_t = a_all[lo:lo + B, :]            # (B, 3H)
            g = jnp.dot(h.astype(jnp.bfloat16), w_hh,
                        preferred_element_type=jnp.float32)  # (B, 3H)
            r = _fast_sigmoid(a_t[:, 0:H] + g[:, 0:H])
            z = _fast_sigmoid(a_t[:, H:2 * H] + g[:, H:2 * H])
            n = jnp.tanh(a_t[:, 2 * H:] + r * (g[:, 2 * H:] + b_hn_b))
            h = (1.0 - z) * n + z * h            # carried state stays f32
            hs.append(h)

        # Layer output stays in registers; no per-step masked VMEM stores.
        layer_in = jnp.concatenate(hs, axis=0).astype(jnp.bfloat16)  # (T*B, H)

    # FC (+ optional sigmoid) epilogue; single dense store of the result.
    y = (jnp.dot(layer_in, fc_w_ref[...], preferred_element_type=jnp.float32)
         + fc_b_ref[...])
    if apply_sigmoid:
        y = _fast_sigmoid(y)
    o_ref[...] = y.astype(o_ref.dtype)


def _full_spec(a):
    zeros = (0,) * a.ndim
    return pl.BlockSpec(a.shape, lambda *_: zeros)


def generator_forward(params, x, sigmoid=True):
    """x: (T, B, z_dim) -> E: (T, B, hidden_dim) float32."""
    T, B, Z = x.shape
    fc_w, fc_b = params["fc"]
    H = fc_w.shape[1]
    L = len(params["gru"])

    # Pad the batch to a multiple of 8 so every per-step (B, .) slab is a
    # full 8-sublane tile (no masked sublane loads/stores in the time loop).
    Bp = max(8, ((B + 7) // 8) * 8)
    if Bp != B:
        x = jnp.pad(x, ((0, 0), (0, Bp - B), (0, 0)))

    x2d = x.reshape(T * Bp, Z).astype(jnp.bfloat16)
    inputs = [x2d]
    for layer_params in params["gru"]:
        inputs.extend(layer_params)
    inputs.extend([fc_w, fc_b])

    kernel = functools.partial(
        _generator_kernel, T=T, B=Bp, H=H, L=L, apply_sigmoid=sigmoid)

    out2d = pl.pallas_call(
        kernel,
        out_shape=jax.ShapeDtypeStruct((T * Bp, H), jnp.float32),
        in_specs=[_full_spec(a) for a in inputs],
        out_specs=pl.BlockSpec((T * Bp, H), lambda *_: (0, 0)),
        compiler_params=pltpu.CompilerParams(
            # ~100 KiB working set; keep the request modest (v7x has 64 MiB/TC).
            vmem_limit_bytes=32 * 1024 * 1024),
    )(*inputs)

    out = out2d.reshape(T, Bp, H)
    return out[:, :B, :]


# ---------------------------------------------------------------------------
# Parameter init (PyTorch-style uniform(-1/sqrt(H), 1/sqrt(H))), packed for
# the kernel:
#   w_ih: (D_in, 3H) bf16, w_hh: (H, 3H) bf16   -- gate blocks [r | z | n]
#   b_a : (1, 3H) f32 = [b_ih_r + b_hh_r, b_ih_z + b_hh_z, b_ih_n]
#   b_hn: (1, H)  f32 (kept separate: PyTorch applies it inside the r-gated term)
# To load a real PyTorch checkpoint: transpose weight_ih_l{k} (3H, D_in) ->
# (D_in, 3H) and weight_hh_l{k} (3H, H) -> (H, 3H) (same [r,z,n] gate order),
# combine biases as above, and transpose fc.weight (H, H) to (in, out).
# ---------------------------------------------------------------------------
def init_generator_params(key, z_dim, hidden_dim, num_layer):
    H = hidden_dim
    bound = 1.0 / math.sqrt(H)
    gru = []
    for layer in range(num_layer):
        d_in = z_dim if layer == 0 else H
        key, k1, k2, k3, k4 = jax.random.split(key, 5)
        w_ih = jax.random.uniform(k1, (d_in, 3 * H), jnp.float32, -bound, bound)
        w_hh = jax.random.uniform(k2, (H, 3 * H), jnp.float32, -bound, bound)
        b_ih = jax.random.uniform(k3, (1, 3 * H), jnp.float32, -bound, bound)
        b_hh = jax.random.uniform(k4, (1, 3 * H), jnp.float32, -bound, bound)
        b_a = jnp.concatenate(
            [b_ih[:, :2 * H] + b_hh[:, :2 * H], b_ih[:, 2 * H:]], axis=1)
        b_hn = b_hh[:, 2 * H:]
        gru.append((w_ih.astype(jnp.bfloat16), w_hh.astype(jnp.bfloat16),
                    b_a, b_hn))
    key, k1, k2 = jax.random.split(key, 3)
    fc_w = jax.random.uniform(k1, (H, H), jnp.float32, -bound, bound)
    fc_b = jax.random.uniform(k2, (1, H), jnp.float32, -bound, bound)
    return {"gru": gru, "fc": (fc_w.astype(jnp.bfloat16), fc_b)}


if __name__ == "__main__":
    # Small shapes consistent with the module: seq=8, batch=4, z_dim=16,
    # hidden_dim=32, num_layer=2.
    seq, batch, z_dim, hidden_dim, num_layer = 8, 4, 16, 32, 2

    key = jax.random.PRNGKey(0)
    key, pkey, xkey = jax.random.split(key, 3)
    params = init_generator_params(pkey, z_dim, hidden_dim, num_layer)
    x = jax.random.normal(xkey, (seq, batch, z_dim), jnp.float32)

    out = generator_forward(params, x, sigmoid=True)
    out = jax.block_until_ready(out)

    assert out.shape == (seq, batch, hidden_dim)
    assert bool(jnp.all(jnp.isfinite(out)))
    assert bool(jnp.all((out >= 0.0) & (out <= 1.0)))  # sigmoid range
    print("KERNEL_OK")
</pallas_src>

<mosaic_0001>
module attributes {stable_mosaic.version = 11 : i64} {
  func.func @_generator_kernel(%arg0: memref<64x16xbf16, #tpu.memory_space<vmem>>, %arg1: memref<16x96xbf16, #tpu.memory_space<vmem>>, %arg2: memref<32x96xbf16, #tpu.memory_space<vmem>>, %arg3: memref<1x96xf32, #tpu.memory_space<vmem>>, %arg4: memref<1x32xf32, #tpu.memory_space<vmem>>, %arg5: memref<32x96xbf16, #tpu.memory_space<vmem>>, %arg6: memref<32x96xbf16, #tpu.memory_space<vmem>>, %arg7: memref<1x96xf32, #tpu.memory_space<vmem>>, %arg8: memref<1x32xf32, #tpu.memory_space<vmem>>, %arg9: memref<32x32xbf16, #tpu.memory_space<vmem>>, %arg10: memref<1x32xf32, #tpu.memory_space<vmem>>, %arg11: memref<64x32xf32, #tpu.memory_space<vmem>>) attributes {dimension_semantics = [], scalar_prefetch = 0 : i64, scratch_operands = 0 : i64, tpu.core_type = #tpu.core_type<tc>} {
    %c0 = arith.constant 0 : index
    %c0_0 = arith.constant 0 : index
    %0 = vector.load %arg0[%c0, %c0_0] : memref<64x16xbf16, #tpu.memory_space<vmem>>, vector<64x16xbf16>
    %c0_1 = arith.constant 0 : index
    %c0_2 = arith.constant 0 : index
    %1 = vector.load %arg1[%c0_1, %c0_2] : memref<16x96xbf16, #tpu.memory_space<vmem>>, vector<16x96xbf16>
    %c0_3 = arith.constant 0 : index
    %c0_4 = arith.constant 0 : index
    %2 = vector.load %arg2[%c0_3, %c0_4] : memref<32x96xbf16, #tpu.memory_space<vmem>>, vector<32x96xbf16>
    %c0_5 = arith.constant 0 : index
    %c0_6 = arith.constant 0 : index
    %3 = vector.load %arg3[%c0_5, %c0_6] : memref<1x96xf32, #tpu.memory_space<vmem>>, vector<1x96xf32>
    %c0_7 = arith.constant 0 : index
    %c0_8 = arith.constant 0 : index
    %4 = vector.load %arg4[%c0_7, %c0_8] : memref<1x32xf32, #tpu.memory_space<vmem>>, vector<1x32xf32>
    %cst = arith.constant dense<0.000000e+00> : vector<64x96xf32>
    %5 = tpu.matmul %0, %1, %cst {dimension_numbers = #tpu.dot_dimension_numbers<[1], [0], [0], [1], [0, 0, 1, 1], [], []>} : vector<64x16xbf16>, vector<16x96xbf16>, vector<64x96xf32> -> vector<64x96xf32>
    %6 = vector.broadcast %3 : vector<1x96xf32> to vector<64x96xf32>
    %7 = arith.addf %5, %6 : vector<64x96xf32>
    %8 = vector.shape_cast %4 : vector<1x32xf32> to vector<1x32xf32>
    %9 = vector.broadcast %8 : vector<1x32xf32> to vector<8x32xf32>
    %cst_9 = arith.constant 0.000000e+00 : f32
    %10 = vector.broadcast %cst_9 : f32 to vector<8x32xf32>
    %11 = vector.extract_strided_slice %7 {offsets = [0, 0], sizes = [8, 96], strides = [1, 1]} : vector<64x96xf32> to vector<8x96xf32>
    %12 = arith.truncf %10 : vector<8x32xf32> to vector<8x32xbf16>
    %cst_10 = arith.constant dense<0.000000e+00> : vector<8x96xf32>
    %13 = tpu.matmul %12, %2, %cst_10 {dimension_numbers = #tpu.dot_dimension_numbers<[1], [0], [0], [1], [0, 0, 1, 1], [], []>} : vector<8x32xbf16>, vector<32x96xbf16>, vector<8x96xf32> -> vector<8x96xf32>
    %14 = vector.extract_strided_slice %11 {offsets = [0, 0], sizes = [8, 32], strides = [1, 1]} : vector<8x96xf32> to vector<8x32xf32>
    %15 = vector.extract_strided_slice %13 {offsets = [0, 0], sizes = [8, 32], strides = [1, 1]} : vector<8x96xf32> to vector<8x32xf32>
    %16 = arith.addf %14, %15 : vector<8x32xf32>
    %cst_11 = arith.constant 5.000000e-01 : f32
    %17 = vector.broadcast %cst_11 : f32 to vector<8x32xf32>
    %18 = arith.mulf %17, %16 : vector<8x32xf32>
    %19 = math.tanh %18 : vector<8x32xf32>
    %cst_12 = arith.constant 1.000000e+00 : f32
    %20 = vector.broadcast %cst_12 : f32 to vector<8x32xf32>
    %21 = arith.addf %19, %20 : vector<8x32xf32>
    %cst_13 = arith.constant 5.000000e-01 : f32
    %22 = vector.broadcast %cst_13 : f32 to vector<8x32xf32>
    %23 = arith.mulf %22, %21 : vector<8x32xf32>
    %24 = vector.extract_strided_slice %11 {offsets = [0, 32], sizes = [8, 32], strides = [1, 1]} : vector<8x96xf32> to vector<8x32xf32>
    %25 = vector.extract_strided_slice %13 {offsets = [0, 32], sizes = [8, 32], strides = [1, 1]} : vector<8x96xf32> to vector<8x32xf32>
    %26 = arith.addf %24, %25 : vector<8x32xf32>
    %cst_14 = arith.constant 5.000000e-01 : f32
    %27 = vector.broadcast %cst_14 : f32 to vector<8x32xf32>
    %28 = arith.mulf %27, %26 : vector<8x32xf32>
    %29 = math.tanh %28 : vector<8x32xf32>
    %cst_15 = arith.constant 1.000000e+00 : f32
    %30 = vector.broadcast %cst_15 : f32 to vector<8x32xf32>
    %31 = arith.addf %29, %30 : vector<8x32xf32>
    %cst_16 = arith.constant 5.000000e-01 : f32
    %32 = vector.broadcast %cst_16 : f32 to vector<8x32xf32>
    %33 = arith.mulf %32, %31 : vector<8x32xf32>
    %34 = vector.extract_strided_slice %11 {offsets = [0, 64], sizes = [8, 32], strides = [1, 1]} : vector<8x96xf32> to vector<8x32xf32>
    %35 = vector.extract_strided_slice %13 {offsets = [0, 64], sizes = [8, 32], strides = [1, 1]} : vector<8x96xf32> to vector<8x32xf32>
    %36 = arith.addf %35, %9 : vector<8x32xf32>
    %37 = arith.mulf %23, %36 : vector<8x32xf32>
    %38 = arith.addf %34, %37 : vector<8x32xf32>
    %39 = math.tanh %38 : vector<8x32xf32>
    %cst_17 = arith.constant 1.000000e+00 : f32
    %40 = vector.broadcast %cst_17 : f32 to vector<8x32xf32>
    %41 = arith.subf %40, %33 : vector<8x32xf32>
    %42 = arith.mulf %41, %39 : vector<8x32xf32>
    %43 = arith.mulf %33, %10 : vector<8x32xf32>
    %44 = arith.addf %42, %43 : vector<8x32xf32>
    %45 = vector.extract_strided_slice %7 {offsets = [8, 0], sizes = [8, 96], strides = [1, 1]} : vector<64x96xf32> to vector<8x96xf32>
    %46 = arith.truncf %44 : vector<8x32xf32> to vector<8x32xbf16>
    %cst_18 = arith.constant dense<0.000000e+00> : vector<8x96xf32>
    %47 = tpu.matmul %46, %2, %cst_18 {dimension_numbers = #tpu.dot_dimension_numbers<[1], [0], [0], [1], [0, 0, 1, 1], [], []>} : vector<8x32xbf16>, vector<32x96xbf16>, vector<8x96xf32> -> vector<8x96xf32>
    %48 = vector.extract_strided_slice %45 {offsets = [0, 0], sizes = [8, 32], strides = [1, 1]} : vector<8x96xf32> to vector<8x32xf32>
    %49 = vector.extract_strided_slice %47 {offsets = [0, 0], sizes = [8, 32], strides = [1, 1]} : vector<8x96xf32> to vector<8x32xf32>
    %50 = arith.addf %48, %49 : vector<8x32xf32>
    %cst_19 = arith.constant 5.000000e-01 : f32
    %51 = vector.broadcast %cst_19 : f32 to vector<8x32xf32>
    %52 = arith.mulf %51, %50 : vector<8x32xf32>
    %53 = math.tanh %52 : vector<8x32xf32>
    %cst_20 = arith.constant 1.000000e+00 : f32
    %54 = vector.broadcast %cst_20 : f32 to vector<8x32xf32>
    %55 = arith.addf %53, %54 : vector<8x32xf32>
    %cst_21 = arith.constant 5.000000e-01 : f32
    %56 = vector.broadcast %cst_21 : f32 to vector<8x32xf32>
    %57 = arith.mulf %56, %55 : vector<8x32xf32>
    %58 = vector.extract_strided_slice %45 {offsets = [0, 32], sizes = [8, 32], strides = [1, 1]} : vector<8x96xf32> to vector<8x32xf32>
    %59 = vector.extract_strided_slice %47 {offsets = [0, 32], sizes = [8, 32], strides = [1, 1]} : vector<8x96xf32> to vector<8x32xf32>
    %60 = arith.addf %58, %59 : vector<8x32xf32>
    %cst_22 = arith.constant 5.000000e-01 : f32
    %61 = vector.broadcast %cst_22 : f32 to vector<8x32xf32>
    %62 = arith.mulf %61, %60 : vector<8x32xf32>
    %63 = math.tanh %62 : vector<8x32xf32>
    %cst_23 = arith.constant 1.000000e+00 : f32
    %64 = vector.broadcast %cst_23 : f32 to vector<8x32xf32>
    %65 = arith.addf %63, %64 : vector<8x32xf32>
    %cst_24 = arith.constant 5.000000e-01 : f32
    %66 = vector.broadcast %cst_24 : f32 to vector<8x32xf32>
    %67 = arith.mulf %66, %65 : vector<8x32xf32>
    %68 = vector.extract_strided_slice %45 {offsets = [0, 64], sizes = [8, 32], strides = [1, 1]} : vector<8x96xf32> to vector<8x32xf32>
    %69 = vector.extract_strided_slice %47 {offsets = [0, 64], sizes = [8, 32], strides = [1, 1]} : vector<8x96xf32> to vector<8x32xf32>
    %70 = arith.addf %69, %9 : vector<8x32xf32>
    %71 = arith.mulf %57, %70 : vector<8x32xf32>
    %72 = arith.addf %68, %71 : vector<8x32xf32>
    %73 = math.tanh %72 : vector<8x32xf32>
    %cst_25 = arith.constant 1.000000e+00 : f32
    %74 = vector.broadcast %cst_25 : f32 to vector<8x32xf32>
    %75 = arith.subf %74, %67 : vector<8x32xf32>
    %76 = arith.mulf %75, %73 : vector<8x32xf32>
    %77 = arith.mulf %67, %44 : vector<8x32xf32>
    %78 = arith.addf %76, %77 : vector<8x32xf32>
    %79 = vector.extract_strided_slice %7 {offsets = [16, 0], sizes = [8, 96], strides = [1, 1]} : vector<64x96xf32> to vector<8x96xf32>
    %80 = arith.truncf %78 : vector<8x32xf32> to vector<8x32xbf16>
    %cst_26 = arith.constant dense<0.000000e+00> : vector<8x96xf32>
    %81 = tpu.matmul %80, %2, %cst_26 {dimension_numbers = #tpu.dot_dimension_numbers<[1], [0], [0], [1], [0, 0, 1, 1], [], []>} : vector<8x32xbf16>, vector<32x96xbf16>, vector<8x96xf32> -> vector<8x96xf32>
    %82 = vector.extract_strided_slice %79 {offsets = [0, 0], sizes = [8, 32], strides = [1, 1]} : vector<8x96xf32> to vector<8x32xf32>
    %83 = vector.extract_strided_slice %81 {offsets = [0, 0], sizes = [8, 32], strides = [1, 1]} : vector<8x96xf32> to vector<8x32xf32>
    %84 = arith.addf %82, %83 : vector<8x32xf32>
    %cst_27 = arith.constant 5.000000e-01 : f32
    %85 = vector.broadcast %cst_27 : f32 to vector<8x32xf32>
    %86 = arith.mulf %85, %84 : vector<8x32xf32>
    %87 = math.tanh %86 : vector<8x32xf32>
    %cst_28 = arith.constant 1.000000e+00 : f32
    %88 = vector.broadcast %cst_28 : f32 to vector<8x32xf32>
    %89 = arith.addf %87, %88 : vector<8x32xf32>
    %cst_29 = arith.constant 5.000000e-01 : f32
    %90 = vector.broadcast %cst_29 : f32 to vector<8x32xf32>
    %91 = arith.mulf %90, %89 : vector<8x32xf32>
    %92 = vector.extract_strided_slice %79 {offsets = [0, 32], sizes = [8, 32], strides = [1, 1]} : vector<8x96xf32> to vector<8x32xf32>
    %93 = vector.extract_strided_slice %81 {offsets = [0, 32], sizes = [8, 32], strides = [1, 1]} : vector<8x96xf32> to vector<8x32xf32>
    %94 = arith.addf %92, %93 : vector<8x32xf32>
    %cst_30 = arith.constant 5.000000e-01 : f32
    %95 = vector.broadcast %cst_30 : f32 to vector<8x32xf32>
    %96 = arith.mulf %95, %94 : vector<8x32xf32>
    %97 = math.tanh %96 : vector<8x32xf32>
    %cst_31 = arith.constant 1.000000e+00 : f32
    %98 = vector.broadcast %cst_31 : f32 to vector<8x32xf32>
    %99 = arith.addf %97, %98 : vector<8x32xf32>
    %cst_32 = arith.constant 5.000000e-01 : f32
    %100 = vector.broadcast %cst_32 : f32 to vector<8x32xf32>
    %101 = arith.mulf %100, %99 : vector<8x32xf32>
    %102 = vector.extract_strided_slice %79 {offsets = [0, 64], sizes = [8, 32], strides = [1, 1]} : vector<8x96xf32> to vector<8x32xf32>
    %103 = vector.extract_strided_slice %81 {offsets = [0, 64], sizes = [8, 32], strides = [1, 1]} : vector<8x96xf32> to vector<8x32xf32>
    %104 = arith.addf %103, %9 : vector<8x32xf32>
    %105 = arith.mulf %91, %104 : vector<8x32xf32>
    %106 = arith.addf %102, %105 : vector<8x32xf32>
    %107 = math.tanh %106 : vector<8x32xf32>
    %cst_33 = arith.constant 1.000000e+00 : f32
    %108 = vector.broadcast %cst_33 : f32 to vector<8x32xf32>
    %109 = arith.subf %108, %101 : vector<8x32xf32>
    %110 = arith.mulf %109, %107 : vector<8x32xf32>
    %111 = arith.mulf %101, %78 : vector<8x32xf32>
    %112 = arith.addf %110, %111 : vector<8x32xf32>
    %113 = vector.extract_strided_slice %7 {offsets = [24, 0], sizes = [8, 96], strides = [1, 1]} : vector<64x96xf32> to vector<8x96xf32>
    %114 = arith.truncf %112 : vector<8x32xf32> to vector<8x32xbf16>
    %cst_34 = arith.constant dense<0.000000e+00> : vector<8x96xf32>
    %115 = tpu.matmul %114, %2, %cst_34 {dimension_numbers = #tpu.dot_dimension_numbers<[1], [0], [0], [1], [0, 0, 1, 1], [], []>} : vector<8x32xbf16>, vector<32x96xbf16>, vector<8x96xf32> -> vector<8x96xf32>
    %116 = vector.extract_strided_slice %113 {offsets = [0, 0], sizes = [8, 32], strides = [1, 1]} : vector<8x96xf32> to vector<8x32xf32>
    %117 = vector.extract_strided_slice %115 {offsets = [0, 0], sizes = [8, 32], strides = [1, 1]} : vector<8x96xf32> to vector<8x32xf32>
    %118 = arith.addf %116, %117 : vector<8x32xf32>
    %cst_35 = arith.constant 5.000000e-01 : f32
    %119 = vector.broadcast %cst_35 : f32 to vector<8x32xf32>
    %120 = arith.mulf %119, %118 : vector<8x32xf32>
    %121 = math.tanh %120 : vector<8x32xf32>
    %cst_36 = arith.constant 1.000000e+00 : f32
    %122 = vector.broadcast %cst_36 : f32 to vector<8x32xf32>
    %123 = arith.addf %121, %122 : vector<8x32xf32>
    %cst_37 = arith.constant 5.000000e-01 : f32
    %124 = vector.broadcast %cst_37 : f32 to vector<8x32xf32>
    %125 = arith.mulf %124, %123 : vector<8x32xf32>
    %126 = vector.extract_strided_slice %113 {offsets = [0, 32], sizes = [8, 32], strides = [1, 1]} : vector<8x96xf32> to vector<8x32xf32>
    %127 = vector.extract_strided_slice %115 {offsets = [0, 32], sizes = [8, 32], strides = [1, 1]} : vector<8x96xf32> to vector<8x32xf32>
    %128 = arith.addf %126, %127 : vector<8x32xf32>
    %cst_38 = arith.constant 5.000000e-01 : f32
    %129 = vector.broadcast %cst_38 : f32 to vector<8x32xf32>
    %130 = arith.mulf %129, %128 : vector<8x32xf32>
    %131 = math.tanh %130 : vector<8x32xf32>
    %cst_39 = arith.constant 1.000000e+00 : f32
    %132 = vector.broadcast %cst_39 : f32 to vector<8x32xf32>
    %133 = arith.addf %131, %132 : vector<8x32xf32>
    %cst_40 = arith.constant 5.000000e-01 : f32
    %134 = vector.broadcast %cst_40 : f32 to vector<8x32xf32>
    %135 = arith.mulf %134, %133 : vector<8x32xf32>
    %136 = vector.extract_strided_slice %113 {offsets = [0, 64], sizes = [8, 32], strides = [1, 1]} : vector<8x96xf32> to vector<8x32xf32>
    %137 = vector.extract_strided_slice %115 {offsets = [0, 64], sizes = [8, 32], strides = [1, 1]} : vector<8x96xf32> to vector<8x32xf32>
    %138 = arith.addf %137, %9 : vector<8x32xf32>
    %139 = arith.mulf %125, %138 : vector<8x32xf32>
    %140 = arith.addf %136, %139 : vector<8x32xf32>
    %141 = math.tanh %140 : vector<8x32xf32>
    %cst_41 = arith.constant 1.000000e+00 : f32
    %142 = vector.broadcast %cst_41 : f32 to vector<8x32xf32>
    %143 = arith.subf %142, %135 : vector<8x32xf32>
    %144 = arith.mulf %143, %141 : vector<8x32xf32>
    %145 = arith.mulf %135, %112 : vector<8x32xf32>
    %146 = arith.addf %144, %145 : vector<8x32xf32>
    %147 = vector.extract_strided_slice %7 {offsets = [32, 0], sizes = [8, 96], strides = [1, 1]} : vector<64x96xf32> to vector<8x96xf32>
    %148 = arith.truncf %146 : vector<8x32xf32> to vector<8x32xbf16>
    %cst_42 = arith.constant dense<0.000000e+00> : vector<8x96xf32>
    %149 = tpu.matmul %148, %2, %cst_42 {dimension_numbers = #tpu.dot_dimension_numbers<[1], [0], [0], [1], [0, 0, 1, 1], [], []>} : vector<8x32xbf16>, vector<32x96xbf16>, vector<8x96xf32> -> vector<8x96xf32>
    %150 = vector.extract_strided_slice %147 {offsets = [0, 0], sizes = [8, 32], strides = [1, 1]} : vector<8x96xf32> to vector<8x32xf32>
    %151 = vector.extract_strided_slice %149 {offsets = [0, 0], sizes = [8, 32], strides = [1, 1]} : vector<8x96xf32> to vector<8x32xf32>
    %152 = arith.addf %150, %151 : vector<8x32xf32>
    %cst_43 = arith.constant 5.000000e-01 : f32
    %153 = vector.broadcast %cst_43 : f32 to vector<8x32xf32>
    %154 = arith.mulf %153, %152 : vector<8x32xf32>
    %155 = math.tanh %154 : vector<8x32xf32>
    %cst_44 = arith.constant 1.000000e+00 : f32
    %156 = vector.broadcast %cst_44 : f32 to vector<8x32xf32>
    %157 = arith.addf %155, %156 : vector<8x32xf32>
    %cst_45 = arith.constant 5.000000e-01 : f32
    %158 = vector.broadcast %cst_45 : f32 to vector<8x32xf32>
    %159 = arith.mulf %158, %157 : vector<8x32xf32>
    %160 = vector.extract_strided_slice %147 {offsets = [0, 32], sizes = [8, 32], strides = [1, 1]} : vector<8x96xf32> to vector<8x32xf32>
    %161 = vector.extract_strided_slice %149 {offsets = [0, 32], sizes = [8, 32], strides = [1, 1]} : vector<8x96xf32> to vector<8x32xf32>
    %162 = arith.addf %160, %161 : vector<8x32xf32>
    %cst_46 = arith.constant 5.000000e-01 : f32
    %163 = vector.broadcast %cst_46 : f32 to vector<8x32xf32>
    %164 = arith.mulf %163, %162 : vector<8x32xf32>
    %165 = math.tanh %164 : vector<8x32xf32>
    %cst_47 = arith.constant 1.000000e+00 : f32
    %166 = vector.broadcast %cst_47 : f32 to vector<8x32xf32>
    %167 = arith.addf %165, %166 : vector<8x32xf32>
    %cst_48 = arith.constant 5.000000e-01 : f32
    %168 = vector.broadcast %cst_48 : f32 to vector<8x32xf32>
    %169 = arith.mulf %168, %167 : vector<8x32xf32>
    %170 = vector.extract_strided_slice %147 {offsets = [0, 64], sizes = [8, 32], strides = [1, 1]} : vector<8x96xf32> to vector<8x32xf32>
    %171 = vector.extract_strided_slice %149 {offsets = [0, 64], sizes = [8, 32], strides = [1, 1]} : vector<8x96xf32> to vector<8x32xf32>
    %172 = arith.addf %171, %9 : vector<8x32xf32>
    %173 = arith.mulf %159, %172 : vector<8x32xf32>
    %174 = arith.addf %170, %173 : vector<8x32xf32>
    %175 = math.tanh %174 : vector<8x32xf32>
    %cst_49 = arith.constant 1.000000e+00 : f32
    %176 = vector.broadcast %cst_49 : f32 to vector<8x32xf32>
    %177 = arith.subf %176, %169 : vector<8x32xf32>
    %178 = arith.mulf %177, %175 : vector<8x32xf32>
    %179 = arith.mulf %169, %146 : vector<8x32xf32>
    %180 = arith.addf %178, %179 : vector<8x32xf32>
    %181 = vector.extract_strided_slice %7 {offsets = [40, 0], sizes = [8, 96], strides = [1, 1]} : vector<64x96xf32> to vector<8x96xf32>
    %182 = arith.truncf %180 : vector<8x32xf32> to vector<8x32xbf16>
    %cst_50 = arith.constant dense<0.000000e+00> : vector<8x96xf32>
    %183 = tpu.matmul %182, %2, %cst_50 {dimension_numbers = #tpu.dot_dimension_numbers<[1], [0], [0], [1], [0, 0, 1, 1], [], []>} : vector<8x32xbf16>, vector<32x96xbf16>, vector<8x96xf32> -> vector<8x96xf32>
    %184 = vector.extract_strided_slice %181 {offsets = [0, 0], sizes = [8, 32], strides = [1, 1]} : vector<8x96xf32> to vector<8x32xf32>
    %185 = vector.extract_strided_slice %183 {offsets = [0, 0], sizes = [8, 32], strides = [1, 1]} : vector<8x96xf32> to vector<8x32xf32>
    %186 = arith.addf %184, %185 : vector<8x32xf32>
    %cst_51 = arith.constant 5.000000e-01 : f32
    %187 = vector.broadcast %cst_51 : f32 to vector<8x32xf32>
    %188 = arith.mulf %187, %186 : vector<8x32xf32>
    %189 = math.tanh %188 : vector<8x32xf32>
    %cst_52 = arith.constant 1.000000e+00 : f32
    %190 = vector.broadcast %cst_52 : f32 to vector<8x32xf32>
    %191 = arith.addf %189, %190 : vector<8x32xf32>
    %cst_53 = arith.constant 5.000000e-01 : f32
    %192 = vector.broadcast %cst_53 : f32 to vector<8x32xf32>
    %193 = arith.mulf %192, %191 : vector<8x32xf32>
    %194 = vector.extract_strided_slice %181 {offsets = [0, 32], sizes = [8, 32], strides = [1, 1]} : vector<8x96xf32> to vector<8x32xf32>
    %195 = vector.extract_strided_slice %183 {offsets = [0, 32], sizes = [8, 32], strides = [1, 1]} : vector<8x96xf32> to vector<8x32xf32>
    %196 = arith.addf %194, %195 : vector<8x32xf32>
    %cst_54 = arith.constant 5.000000e-01 : f32
    %197 = vector.broadcast %cst_54 : f32 to vector<8x32xf32>
    %198 = arith.mulf %197, %196 : vector<8x32xf32>
    %199 = math.tanh %198 : vector<8x32xf32>
    %cst_55 = arith.constant 1.000000e+00 : f32
    %200 = vector.broadcast %cst_55 : f32 to vector<8x32xf32>
    %201 = arith.addf %199, %200 : vector<8x32xf32>
    %cst_56 = arith.constant 5.000000e-01 : f32
    %202 = vector.broadcast %cst_56 : f32 to vector<8x32xf32>
    %203 = arith.mulf %202, %201 : vector<8x32xf32>
    %204 = vector.extract_strided_slice %181 {offsets = [0, 64], sizes = [8, 32], strides = [1, 1]} : vector<8x96xf32> to vector<8x32xf32>
    %205 = vector.extract_strided_slice %183 {offsets = [0, 64], sizes = [8, 32], strides = [1, 1]} : vector<8x96xf32> to vector<8x32xf32>
    %206 = arith.addf %205, %9 : vector<8x32xf32>
    %207 = arith.mulf %193, %206 : vector<8x32xf32>
    %208 = arith.addf %204, %207 : vector<8x32xf32>
    %209 = math.tanh %208 : vector<8x32xf32>
    %cst_57 = arith.constant 1.000000e+00 : f32
    %210 = vector.broadcast %cst_57 : f32 to vector<8x32xf32>
    %211 = arith.subf %210, %203 : vector<8x32xf32>
    %212 = arith.mulf %211, %209 : vector<8x32xf32>
    %213 = arith.mulf %203, %180 : vector<8x32xf32>
    %214 = arith.addf %212, %213 : vector<8x32xf32>
    %215 = vector.extract_strided_slice %7 {offsets = [48, 0], sizes = [8, 96], strides = [1, 1]} : vector<64x96xf32> to vector<8x96xf32>
    %216 = arith.truncf %214 : vector<8x32xf32> to vector<8x32xbf16>
    %cst_58 = arith.constant dense<0.000000e+00> : vector<8x96xf32>
    %217 = tpu.matmul %216, %2, %cst_58 {dimension_numbers = #tpu.dot_dimension_numbers<[1], [0], [0], [1], [0, 0, 1, 1], [], []>} : vector<8x32xbf16>, vector<32x96xbf16>, vector<8x96xf32> -> vector<8x96xf32>
    %218 = vector.extract_strided_slice %215 {offsets = [0, 0], sizes = [8, 32], strides = [1, 1]} : vector<8x96xf32> to vector<8x32xf32>
    %219 = vector.extract_strided_slice %217 {offsets = [0, 0], sizes = [8, 32], strides = [1, 1]} : vector<8x96xf32> to vector<8x32xf32>
    %220 = arith.addf %218, %219 : vector<8x32xf32>
    %cst_59 = arith.constant 5.000000e-01 : f32
    %221 = vector.broadcast %cst_59 : f32 to vector<8x32xf32>
    %222 = arith.mulf %221, %220 : vector<8x32xf32>
    %223 = math.tanh %222 : vector<8x32xf32>
    %cst_60 = arith.constant 1.000000e+00 : f32
    %224 = vector.broadcast %cst_60 : f32 to vector<8x32xf32>
    %225 = arith.addf %223, %224 : vector<8x32xf32>
    %cst_61 = arith.constant 5.000000e-01 : f32
    %226 = vector.broadcast %cst_61 : f32 to vector<8x32xf32>
    %227 = arith.mulf %226, %225 : vector<8x32xf32>
    %228 = vector.extract_strided_slice %215 {offsets = [0, 32], sizes = [8, 32], strides = [1, 1]} : vector<8x96xf32> to vector<8x32xf32>
    %229 = vector.extract_strided_slice %217 {offsets = [0, 32], sizes = [8, 32], strides = [1, 1]} : vector<8x96xf32> to vector<8x32xf32>
    %230 = arith.addf %228, %229 : vector<8x32xf32>
    %cst_62 = arith.constant 5.000000e-01 : f32
    %231 = vector.broadcast %cst_62 : f32 to vector<8x32xf32>
    %232 = arith.mulf %231, %230 : vector<8x32xf32>
    %233 = math.tanh %232 : vector<8x32xf32>
    %cst_63 = arith.constant 1.000000e+00 : f32
    %234 = vector.broadcast %cst_63 : f32 to vector<8x32xf32>
    %235 = arith.addf %233, %234 : vector<8x32xf32>
    %cst_64 = arith.constant 5.000000e-01 : f32
    %236 = vector.broadcast %cst_64 : f32 to vector<8x32xf32>
    %237 = arith.mulf %236, %235 : vector<8x32xf32>
    %238 = vector.extract_strided_slice %215 {offsets = [0, 64], sizes = [8, 32], strides = [1, 1]} : vector<8x96xf32> to vector<8x32xf32>
    %239 = vector.extract_strided_slice %217 {offsets = [0, 64], sizes = [8, 32], strides = [1, 1]} : vector<8x96xf32> to vector<8x32xf32>
    %240 = arith.addf %239, %9 : vector<8x32xf32>
    %241 = arith.mulf %227, %240 : vector<8x32xf32>
    %242 = arith.addf %238, %241 : vector<8x32xf32>
    %243 = math.tanh %242 : vector<8x32xf32>
    %cst_65 = arith.constant 1.000000e+00 : f32
    %244 = vector.broadcast %cst_65 : f32 to vector<8x32xf32>
    %245 = arith.subf %244, %237 : vector<8x32xf32>
    %246 = arith.mulf %245, %243 : vector<8x32xf32>
    %247 = arith.mulf %237, %214 : vector<8x32xf32>
    %248 = arith.addf %246, %247 : vector<8x32xf32>
    %249 = vector.extract_strided_slice %7 {offsets = [56, 0], sizes = [8, 96], strides = [1, 1]} : vector<64x96xf32> to vector<8x96xf32>
    %250 = arith.truncf %248 : vector<8x32xf32> to vector<8x32xbf16>
    %cst_66 = arith.constant dense<0.000000e+00> : vector<8x96xf32>
    %251 = tpu.matmul %250, %2, %cst_66 {dimension_numbers = #tpu.dot_dimension_numbers<[1], [0], [0], [1], [0, 0, 1, 1], [], []>} : vector<8x32xbf16>, vector<32x96xbf16>, vector<8x96xf32> -> vector<8x96xf32>
    %252 = vector.extract_strided_slice %249 {offsets = [0, 0], sizes = [8, 32], strides = [1, 1]} : vector<8x96xf32> to vector<8x32xf32>
    %253 = vector.extract_strided_slice %251 {offsets = [0, 0], sizes = [8, 32], strides = [1, 1]} : vector<8x96xf32> to vector<8x32xf32>
    %254 = arith.addf %252, %253 : vector<8x32xf32>
    %cst_67 = arith.constant 5.000000e-01 : f32
    %255 = vector.broadcast %cst_67 : f32 to vector<8x32xf32>
    %256 = arith.mulf %255, %254 : vector<8x32xf32>
    %257 = math.tanh %256 : vector<8x32xf32>
    %cst_68 = arith.constant 1.000000e+00 : f32
    %258 = vector.broadcast %cst_68 : f32 to vector<8x32xf32>
    %259 = arith.addf %257, %258 : vector<8x32xf32>
    %cst_69 = arith.constant 5.000000e-01 : f32
    %260 = vector.broadcast %cst_69 : f32 to vector<8x32xf32>
    %261 = arith.mulf %260, %259 : vector<8x32xf32>
    %262 = vector.extract_strided_slice %249 {offsets = [0, 32], sizes = [8, 32], strides = [1, 1]} : vector<8x96xf32> to vector<8x32xf32>
    %263 = vector.extract_strided_slice %251 {offsets = [0, 32], sizes = [8, 32], strides = [1, 1]} : vector<8x96xf32> to vector<8x32xf32>
    %264 = arith.addf %262, %263 : vector<8x32xf32>
    %cst_70 = arith.constant 5.000000e-01 : f32
    %265 = vector.broadcast %cst_70 : f32 to vector<8x32xf32>
    %266 = arith.mulf %265, %264 : vector<8x32xf32>
    %267 = math.tanh %266 : vector<8x32xf32>
    %cst_71 = arith.constant 1.000000e+00 : f32
    %268 = vector.broadcast %cst_71 : f32 to vector<8x32xf32>
    %269 = arith.addf %267, %268 : vector<8x32xf32>
    %cst_72 = arith.constant 5.000000e-01 : f32
    %270 = vector.broadcast %cst_72 : f32 to vector<8x32xf32>
    %271 = arith.mulf %270, %269 : vector<8x32xf32>
    %272 = vector.extract_strided_slice %249 {offsets = [0, 64], sizes = [8, 32], strides = [1, 1]} : vector<8x96xf32> to vector<8x32xf32>
    %273 = vector.extract_strided_slice %251 {offsets = [0, 64], sizes = [8, 32], strides = [1, 1]} : vector<8x96xf32> to vector<8x32xf32>
    %274 = arith.addf %273, %9 : vector<8x32xf32>
    %275 = arith.mulf %261, %274 : vector<8x32xf32>
    %276 = arith.addf %272, %275 : vector<8x32xf32>
    %277 = math.tanh %276 : vector<8x32xf32>
    %cst_73 = arith.constant 1.000000e+00 : f32
    %278 = vector.broadcast %cst_73 : f32 to vector<8x32xf32>
    %279 = arith.subf %278, %271 : vector<8x32xf32>
    %280 = arith.mulf %279, %277 : vector<8x32xf32>
    %281 = arith.mulf %271, %248 : vector<8x32xf32>
    %282 = arith.addf %280, %281 : vector<8x32xf32>
    %283 = tpu.concatenate %44, %78, %112, %146, %180, %214, %248, %282 in 0 : vector<8x32xf32>, vector<8x32xf32>, vector<8x32xf32>, vector<8x32xf32>, vector<8x32xf32>, vector<8x32xf32>, vector<8x32xf32>, vector<8x32xf32> -> vector<64x32xf32>
    %284 = arith.truncf %283 : vector<64x32xf32> to vector<64x32xbf16>
    %c0_74 = arith.constant 0 : index
    %c0_75 = arith.constant 0 : index
    %285 = vector.load %arg5[%c0_74, %c0_75] : memref<32x96xbf16, #tpu.memory_space<vmem>>, vector<32x96xbf16>
    %c0_76 = arith.constant 0 : index
    %c0_77 = arith.constant 0 : index
    %286 = vector.load %arg6[%c0_76, %c0_77] : memref<32x96xbf16, #tpu.memory_space<vmem>>, vector<32x96xbf16>
    %c0_78 = arith.constant 0 : index
    %c0_79 = arith.constant 0 : index
    %287 = vector.load %arg7[%c0_78, %c0_79] : memref<1x96xf32, #tpu.memory_space<vmem>>, vector<1x96xf32>
    %c0_80 = arith.constant 0 : index
    %c0_81 = arith.constant 0 : index
    %288 = vector.load %arg8[%c0_80, %c0_81] : memref<1x32xf32, #tpu.memory_space<vmem>>, vector<1x32xf32>
    %cst_82 = arith.constant dense<0.000000e+00> : vector<64x96xf32>
    %289 = tpu.matmul %284, %285, %cst_82 {dimension_numbers = #tpu.dot_dimension_numbers<[1], [0], [0], [1], [0, 0, 1, 1], [], []>} : vector<64x32xbf16>, vector<32x96xbf16>, vector<64x96xf32> -> vector<64x96xf32>
    %290 = vector.broadcast %287 : vector<1x96xf32> to vector<64x96xf32>
    %291 = arith.addf %289, %290 : vector<64x96xf32>
    %292 = vector.shape_cast %288 : vector<1x32xf32> to vector<1x32xf32>
    %293 = vector.broadcast %292 : vector<1x32xf32> to vector<8x32xf32>
    %cst_83 = arith.constant 0.000000e+00 : f32
    %294 = vector.broadcast %cst_83 : f32 to vector<8x32xf32>
    %295 = vector.extract_strided_slice %291 {offsets = [0, 0], sizes = [8, 96], strides = [1, 1]} : vector<64x96xf32> to vector<8x96xf32>
    %296 = arith.truncf %294 : vector<8x32xf32> to vector<8x32xbf16>
    %cst_84 = arith.constant dense<0.000000e+00> : vector<8x96xf32>
    %297 = tpu.matmul %296, %286, %cst_84 {dimension_numbers = #tpu.dot_dimension_numbers<[1], [0], [0], [1], [0, 0, 1, 1], [], []>} : vector<8x32xbf16>, vector<32x96xbf16>, vector<8x96xf32> -> vector<8x96xf32>
    %298 = vector.extract_strided_slice %295 {offsets = [0, 0], sizes = [8, 32], strides = [1, 1]} : vector<8x96xf32> to vector<8x32xf32>
    %299 = vector.extract_strided_slice %297 {offsets = [0, 0], sizes = [8, 32], strides = [1, 1]} : vector<8x96xf32> to vector<8x32xf32>
    %300 = arith.addf %298, %299 : vector<8x32xf32>
    %cst_85 = arith.constant 5.000000e-01 : f32
    %301 = vector.broadcast %cst_85 : f32 to vector<8x32xf32>
    %302 = arith.mulf %301, %300 : vector<8x32xf32>
    %303 = math.tanh %302 : vector<8x32xf32>
    %cst_86 = arith.constant 1.000000e+00 : f32
    %304 = vector.broadcast %cst_86 : f32 to vector<8x32xf32>
    %305 = arith.addf %303, %304 : vector<8x32xf32>
    %cst_87 = arith.constant 5.000000e-01 : f32
    %306 = vector.broadcast %cst_87 : f32 to vector<8x32xf32>
    %307 = arith.mulf %306, %305 : vector<8x32xf32>
    %308 = vector.extract_strided_slice %295 {offsets = [0, 32], sizes = [8, 32], strides = [1, 1]} : vector<8x96xf32> to vector<8x32xf32>
    %309 = vector.extract_strided_slice %297 {offsets = [0, 32], sizes = [8, 32], strides = [1, 1]} : vector<8x96xf32> to vector<8x32xf32>
    %310 = arith.addf %308, %309 : vector<8x32xf32>
    %cst_88 = arith.constant 5.000000e-01 : f32
    %311 = vector.broadcast %cst_88 : f32 to vector<8x32xf32>
    %312 = arith.mulf %311, %310 : vector<8x32xf32>
    %313 = math.tanh %312 : vector<8x32xf32>
    %cst_89 = arith.constant 1.000000e+00 : f32
    %314 = vector.broadcast %cst_89 : f32 to vector<8x32xf32>
    %315 = arith.addf %313, %314 : vector<8x32xf32>
    %cst_90 = arith.constant 5.000000e-01 : f32
    %316 = vector.broadcast %cst_90 : f32 to vector<8x32xf32>
    %317 = arith.mulf %316, %315 : vector<8x32xf32>
    %318 = vector.extract_strided_slice %295 {offsets = [0, 64], sizes = [8, 32], strides = [1, 1]} : vector<8x96xf32> to vector<8x32xf32>
    %319 = vector.extract_strided_slice %297 {offsets = [0, 64], sizes = [8, 32], strides = [1, 1]} : vector<8x96xf32> to vector<8x32xf32>
    %320 = arith.addf %319, %293 : vector<8x32xf32>
    %321 = arith.mulf %307, %320 : vector<8x32xf32>
    %322 = arith.addf %318, %321 : vector<8x32xf32>
    %323 = math.tanh %322 : vector<8x32xf32>
    %cst_91 = arith.constant 1.000000e+00 : f32
    %324 = vector.broadcast %cst_91 : f32 to vector<8x32xf32>
    %325 = arith.subf %324, %317 : vector<8x32xf32>
    %326 = arith.mulf %325, %323 : vector<8x32xf32>
    %327 = arith.mulf %317, %294 : vector<8x32xf32>
    %328 = arith.addf %326, %327 : vector<8x32xf32>
    %329 = vector.extract_strided_slice %291 {offsets = [8, 0], sizes = [8, 96], strides = [1, 1]} : vector<64x96xf32> to vector<8x96xf32>
    %330 = arith.truncf %328 : vector<8x32xf32> to vector<8x32xbf16>
    %cst_92 = arith.constant dense<0.000000e+00> : vector<8x96xf32>
    %331 = tpu.matmul %330, %286, %cst_92 {dimension_numbers = #tpu.dot_dimension_numbers<[1], [0], [0], [1], [0, 0, 1, 1], [], []>} : vector<8x32xbf16>, vector<32x96xbf16>, vector<8x96xf32> -> vector<8x96xf32>
    %332 = vector.extract_strided_slice %329 {offsets = [0, 0], sizes = [8, 32], strides = [1, 1]} : vector<8x96xf32> to vector<8x32xf32>
    %333 = vector.extract_strided_slice %331 {offsets = [0, 0], sizes = [8, 32], strides = [1, 1]} : vector<8x96xf32> to vector<8x32xf32>
    %334 = arith.addf %332, %333 : vector<8x32xf32>
    %cst_93 = arith.constant 5.000000e-01 : f32
    %335 = vector.broadcast %cst_93 : f32 to vector<8x32xf32>
    %336 = arith.mulf %335, %334 : vector<8x32xf32>
    %337 = math.tanh %336 : vector<8x32xf32>
    %cst_94 = arith.constant 1.000000e+00 : f32
    %338 = vector.broadcast %cst_94 : f32 to vector<8x32xf32>
    %339 = arith.addf %337, %338 : vector<8x32xf32>
    %cst_95 = arith.constant 5.000000e-01 : f32
    %340 = vector.broadcast %cst_95 : f32 to vector<8x32xf32>
    %341 = arith.mulf %340, %339 : vector<8x32xf32>
    %342 = vector.extract_strided_slice %329 {offsets = [0, 32], sizes = [8, 32], strides = [1, 1]} : vector<8x96xf32> to vector<8x32xf32>
    %343 = vector.extract_strided_slice %331 {offsets = [0, 32], sizes = [8, 32], strides = [1, 1]} : vector<8x96xf32> to vector<8x32xf32>
    %344 = arith.addf %342, %343 : vector<8x32xf32>
    %cst_96 = arith.constant 5.000000e-01 : f32
    %345 = vector.broadcast %cst_96 : f32 to vector<8x32xf32>
    %346 = arith.mulf %345, %344 : vector<8x32xf32>
    %347 = math.tanh %346 : vector<8x32xf32>
    %cst_97 = arith.constant 1.000000e+00 : f32
    %348 = vector.broadcast %cst_97 : f32 to vector<8x32xf32>
    %349 = arith.addf %347, %348 : vector<8x32xf32>
    %cst_98 = arith.constant 5.000000e-01 : f32
    %350 = vector.broadcast %cst_98 : f32 to vector<8x32xf32>
    %351 = arith.mulf %350, %349 : vector<8x32xf32>
    %352 = vector.extract_strided_slice %329 {offsets = [0, 64], sizes = [8, 32], strides = [1, 1]} : vector<8x96xf32> to vector<8x32xf32>
    %353 = vector.extract_strided_slice %331 {offsets = [0, 64], sizes = [8, 32], strides = [1, 1]} : vector<8x96xf32> to vector<8x32xf32>
    %354 = arith.addf %353, %293 : vector<8x32xf32>
    %355 = arith.mulf %341, %354 : vector<8x32xf32>
    %356 = arith.addf %352, %355 : vector<8x32xf32>
    %357 = math.tanh %356 : vector<8x32xf32>
    %cst_99 = arith.constant 1.000000e+00 : f32
    %358 = vector.broadcast %cst_99 : f32 to vector<8x32xf32>
    %359 = arith.subf %358, %351 : vector<8x32xf32>
    %360 = arith.mulf %359, %357 : vector<8x32xf32>
    %361 = arith.mulf %351, %328 : vector<8x32xf32>
    %362 = arith.addf %360, %361 : vector<8x32xf32>
    %363 = vector.extract_strided_slice %291 {offsets = [16, 0], sizes = [8, 96], strides = [1, 1]} : vector<64x96xf32> to vector<8x96xf32>
    %364 = arith.truncf %362 : vector<8x32xf32> to vector<8x32xbf16>
    %cst_100 = arith.constant dense<0.000000e+00> : vector<8x96xf32>
    %365 = tpu.matmul %364, %286, %cst_100 {dimension_numbers = #tpu.dot_dimension_numbers<[1], [0], [0], [1], [0, 0, 1, 1], [], []>} : vector<8x32xbf16>, vector<32x96xbf16>, vector<8x96xf32> -> vector<8x96xf32>
    %366 = vector.extract_strided_slice %363 {offsets = [0, 0], sizes = [8, 32], strides = [1, 1]} : vector<8x96xf32> to vector<8x32xf32>
    %367 = vector.extract_strided_slice %365 {offsets = [0, 0], sizes = [8, 32], strides = [1, 1]} : vector<8x96xf32> to vector<8x32xf32>
    %368 = arith.addf %366, %367 : vector<8x32xf32>
    %cst_101 = arith.constant 5.000000e-01 : f32
    %369 = vector.broadcast %cst_101 : f32 to vector<8x32xf32>
    %370 = arith.mulf %369, %368 : vector<8x32xf32>
    %371 = math.tanh %370 : vector<8x32xf32>
    %cst_102 = arith.constant 1.000000e+00 : f32
    %372 = vector.broadcast %cst_102 : f32 to vector<8x32xf32>
    %373 = arith.addf %371, %372 : vector<8x32xf32>
    %cst_103 = arith.constant 5.000000e-01 : f32
    %374 = vector.broadcast %cst_103 : f32 to vector<8x32xf32>
    %375 = arith.mulf %374, %373 : vector<8x32xf32>
    %376 = vector.extract_strided_slice %363 {offsets = [0, 32], sizes = [8, 32], strides = [1, 1]} : vector<8x96xf32> to vector<8x32xf32>
    %377 = vector.extract_strided_slice %365 {offsets = [0, 32], sizes = [8, 32], strides = [1, 1]} : vector<8x96xf32> to vector<8x32xf32>
    %378 = arith.addf %376, %377 : vector<8x32xf32>
    %cst_104 = arith.constant 5.000000e-01 : f32
    %379 = vector.broadcast %cst_104 : f32 to vector<8x32xf32>
    %380 = arith.mulf %379, %378 : vector<8x32xf32>
    %381 = math.tanh %380 : vector<8x32xf32>
    %cst_105 = arith.constant 1.000000e+00 : f32
    %382 = vector.broadcast %cst_105 : f32 to vector<8x32xf32>
    %383 = arith.addf %381, %382 : vector<8x32xf32>
    %cst_106 = arith.constant 5.000000e-01 : f32
    %384 = vector.broadcast %cst_106 : f32 to vector<8x32xf32>
    %385 = arith.mulf %384, %383 : vector<8x32xf32>
    %386 = vector.extract_strided_slice %363 {offsets = [0, 64], sizes = [8, 32], strides = [1, 1]} : vector<8x96xf32> to vector<8x32xf32>
    %387 = vector.extract_strided_slice %365 {offsets = [0, 64], sizes = [8, 32], strides = [1, 1]} : vector<8x96xf32> to vector<8x32xf32>
    %388 = arith.addf %387, %293 : vector<8x32xf32>
    %389 = arith.mulf %375, %388 : vector<8x32xf32>
    %390 = arith.addf %386, %389 : vector<8x32xf32>
    %391 = math.tanh %390 : vector<8x32xf32>
    %cst_107 = arith.constant 1.000000e+00 : f32
    %392 = vector.broadcast %cst_107 : f32 to vector<8x32xf32>
    %393 = arith.subf %392, %385 : vector<8x32xf32>
    %394 = arith.mulf %393, %391 : vector<8x32xf32>
    %395 = arith.mulf %385, %362 : vector<8x32xf32>
    %396 = arith.addf %394, %395 : vector<8x32xf32>
    %397 = vector.extract_strided_slice %291 {offsets = [24, 0], sizes = [8, 96], strides = [1, 1]} : vector<64x96xf32> to vector<8x96xf32>
    %398 = arith.truncf %396 : vector<8x32xf32> to vector<8x32xbf16>
    %cst_108 = arith.constant dense<0.000000e+00> : vector<8x96xf32>
    %399 = tpu.matmul %398, %286, %cst_108 {dimension_numbers = #tpu.dot_dimension_numbers<[1], [0], [0], [1], [0, 0, 1, 1], [], []>} : vector<8x32xbf16>, vector<32x96xbf16>, vector<8x96xf32> -> vector<8x96xf32>
    %400 = vector.extract_strided_slice %397 {offsets = [0, 0], sizes = [8, 32], strides = [1, 1]} : vector<8x96xf32> to vector<8x32xf32>
    %401 = vector.extract_strided_slice %399 {offsets = [0, 0], sizes = [8, 32], strides = [1, 1]} : vector<8x96xf32> to vector<8x32xf32>
    %402 = arith.addf %400, %401 : vector<8x32xf32>
    %cst_109 = arith.constant 5.000000e-01 : f32
    %403 = vector.broadcast %cst_109 : f32 to vector<8x32xf32>
    %404 = arith.mulf %403, %402 : vector<8x32xf32>
    %405 = math.tanh %404 : vector<8x32xf32>
    %cst_110 = arith.constant 1.000000e+00 : f32
    %406 = vector.broadcast %cst_110 : f32 to vector<8x32xf32>
    %407 = arith.addf %405, %406 : vector<8x32xf32>
    %cst_111 = arith.constant 5.000000e-01 : f32
    %408 = vector.broadcast %cst_111 : f32 to vector<8x32xf32>
    %409 = arith.mulf %408, %407 : vector<8x32xf32>
    %410 = vector.extract_strided_slice %397 {offsets = [0, 32], sizes = [8, 32], strides = [1, 1]} : vector<8x96xf32> to vector<8x32xf32>
    %411 = vector.extract_strided_slice %399 {offsets = [0, 32], sizes = [8, 32], strides = [1, 1]} : vector<8x96xf32> to vector<8x32xf32>
    %412 = arith.addf %410, %411 : vector<8x32xf32>
    %cst_112 = arith.constant 5.000000e-01 : f32
    %413 = vector.broadcast %cst_112 : f32 to vector<8x32xf32>
    %414 = arith.mulf %413, %412 : vector<8x32xf32>
    %415 = math.tanh %414 : vector<8x32xf32>
    %cst_113 = arith.constant 1.000000e+00 : f32
    %416 = vector.broadcast %cst_113 : f32 to vector<8x32xf32>
    %417 = arith.addf %415, %416 : vector<8x32xf32>
    %cst_114 = arith.constant 5.000000e-01 : f32
    %418 = vector.broadcast %cst_114 : f32 to vector<8x32xf32>
    %419 = arith.mulf %418, %417 : vector<8x32xf32>
    %420 = vector.extract_strided_slice %397 {offsets = [0, 64], sizes = [8, 32], strides = [1, 1]} : vector<8x96xf32> to vector<8x32xf32>
    %421 = vector.extract_strided_slice %399 {offsets = [0, 64], sizes = [8, 32], strides = [1, 1]} : vector<8x96xf32> to vector<8x32xf32>
    %422 = arith.addf %421, %293 : vector<8x32xf32>
    %423 = arith.mulf %409, %422 : vector<8x32xf32>
    %424 = arith.addf %420, %423 : vector<8x32xf32>
    %425 = math.tanh %424 : vector<8x32xf32>
    %cst_115 = arith.constant 1.000000e+00 : f32
    %426 = vector.broadcast %cst_115 : f32 to vector<8x32xf32>
    %427 = arith.subf %426, %419 : vector<8x32xf32>
    %428 = arith.mulf %427, %425 : vector<8x32xf32>
    %429 = arith.mulf %419, %396 : vector<8x32xf32>
    %430 = arith.addf %428, %429 : vector<8x32xf32>
    %431 = vector.extract_strided_slice %291 {offsets = [32, 0], sizes = [8, 96], strides = [1, 1]} : vector<64x96xf32> to vector<8x96xf32>
    %432 = arith.truncf %430 : vector<8x32xf32> to vector<8x32xbf16>
    %cst_116 = arith.constant dense<0.000000e+00> : vector<8x96xf32>
    %433 = tpu.matmul %432, %286, %cst_116 {dimension_numbers = #tpu.dot_dimension_numbers<[1], [0], [0], [1], [0, 0, 1, 1], [], []>} : vector<8x32xbf16>, vector<32x96xbf16>, vector<8x96xf32> -> vector<8x96xf32>
    %434 = vector.extract_strided_slice %431 {offsets = [0, 0], sizes = [8, 32], strides = [1, 1]} : vector<8x96xf32> to vector<8x32xf32>
    %435 = vector.extract_strided_slice %433 {offsets = [0, 0], sizes = [8, 32], strides = [1, 1]} : vector<8x96xf32> to vector<8x32xf32>
    %436 = arith.addf %434, %435 : vector<8x32xf32>
    %cst_117 = arith.constant 5.000000e-01 : f32
    %437 = vector.broadcast %cst_117 : f32 to vector<8x32xf32>
    %438 = arith.mulf %437, %436 : vector<8x32xf32>
    %439 = math.tanh %438 : vector<8x32xf32>
    %cst_118 = arith.constant 1.000000e+00 : f32
    %440 = vector.broadcast %cst_118 : f32 to vector<8x32xf32>
    %441 = arith.addf %439, %440 : vector<8x32xf32>
    %cst_119 = arith.constant 5.000000e-01 : f32
    %442 = vector.broadcast %cst_119 : f32 to vector<8x32xf32>
    %443 = arith.mulf %442, %441 : vector<8x32xf32>
    %444 = vector.extract_strided_slice %431 {offsets = [0, 32], sizes = [8, 32], strides = [1, 1]} : vector<8x96xf32> to vector<8x32xf32>
    %445 = vector.extract_strided_slice %433 {offsets = [0, 32], sizes = [8, 32], strides = [1, 1]} : vector<8x96xf32> to vector<8x32xf32>
    %446 = arith.addf %444, %445 : vector<8x32xf32>
    %cst_120 = arith.constant 5.000000e-01 : f32
    %447 = vector.broadcast %cst_120 : f32 to vector<8x32xf32>
    %448 = arith.mulf %447, %446 : vector<8x32xf32>
    %449 = math.tanh %448 : vector<8x32xf32>
    %cst_121 = arith.constant 1.000000e+00 : f32
    %450 = vector.broadcast %cst_121 : f32 to vector<8x32xf32>
    %451 = arith.addf %449, %450 : vector<8x32xf32>
    %cst_122 = arith.constant 5.000000e-01 : f32
    %452 = vector.broadcast %cst_122 : f32 to vector<8x32xf32>
    %453 = arith.mulf %452, %451 : vector<8x32xf32>
    %454 = vector.extract_strided_slice %431 {offsets = [0, 64], sizes = [8, 32], strides = [1, 1]} : vector<8x96xf32> to vector<8x32xf32>
    %455 = vector.extract_strided_slice %433 {offsets = [0, 64], sizes = [8, 32], strides = [1, 1]} : vector<8x96xf32> to vector<8x32xf32>
    %456 = arith.addf %455, %293 : vector<8x32xf32>
    %457 = arith.mulf %443, %456 : vector<8x32xf32>
    %458 = arith.addf %454, %457 : vector<8x32xf32>
    %459 = math.tanh %458 : vector<8x32xf32>
    %cst_123 = arith.constant 1.000000e+00 : f32
    %460 = vector.broadcast %cst_123 : f32 to vector<8x32xf32>
    %461 = arith.subf %460, %453 : vector<8x32xf32>
    %462 = arith.mulf %461, %459 : vector<8x32xf32>
    %463 = arith.mulf %453, %430 : vector<8x32xf32>
    %464 = arith.addf %462, %463 : vector<8x32xf32>
    %465 = vector.extract_strided_slice %291 {offsets = [40, 0], sizes = [8, 96], strides = [1, 1]} : vector<64x96xf32> to vector<8x96xf32>
    %466 = arith.truncf %464 : vector<8x32xf32> to vector<8x32xbf16>
    %cst_124 = arith.constant dense<0.000000e+00> : vector<8x96xf32>
    %467 = tpu.matmul %466, %286, %cst_124 {dimension_numbers = #tpu.dot_dimension_numbers<[1], [0], [0], [1], [0, 0, 1, 1], [], []>} : vector<8x32xbf16>, vector<32x96xbf16>, vector<8x96xf32> -> vector<8x96xf32>
    %468 = vector.extract_strided_slice %465 {offsets = [0, 0], sizes = [8, 32], strides = [1, 1]} : vector<8x96xf32> to vector<8x32xf32>
    %469 = vector.extract_strided_slice %467 {offsets = [0, 0], sizes = [8, 32], strides = [1, 1]} : vector<8x96xf32> to vector<8x32xf32>
    %470 = arith.addf %468, %469 : vector<8x32xf32>
    %cst_125 = arith.constant 5.000000e-01 : f32
    %471 = vector.broadcast %cst_125 : f32 to vector<8x32xf32>
    %472 = arith.mulf %471, %470 : vector<8x32xf32>
    %473 = math.tanh %472 : vector<8x32xf32>
    %cst_126 = arith.constant 1.000000e+00 : f32
    %474 = vector.broadcast %cst_126 : f32 to vector<8x32xf32>
    %475 = arith.addf %473, %474 : vector<8x32xf32>
    %cst_127 = arith.constant 5.000000e-01 : f32
    %476 = vector.broadcast %cst_127 : f32 to vector<8x32xf32>
    %477 = arith.mulf %476, %475 : vector<8x32xf32>
    %478 = vector.extract_strided_slice %465 {offsets = [0, 32], sizes = [8, 32], strides = [1, 1]} : vector<8x96xf32> to vector<8x32xf32>
    %479 = vector.extract_strided_slice %467 {offsets = [0, 32], sizes = [8, 32], strides = [1, 1]} : vector<8x96xf32> to vector<8x32xf32>
    %480 = arith.addf %478, %479 : vector<8x32xf32>
    %cst_128 = arith.constant 5.000000e-01 : f32
    %481 = vector.broadcast %cst_128 : f32 to vector<8x32xf32>
    %482 = arith.mulf %481, %480 : vector<8x32xf32>
    %483 = math.tanh %482 : vector<8x32xf32>
    %cst_129 = arith.constant 1.000000e+00 : f32
    %484 = vector.broadcast %cst_129 : f32 to vector<8x32xf32>
    %485 = arith.addf %483, %484 : vector<8x32xf32>
    %cst_130 = arith.constant 5.000000e-01 : f32
    %486 = vector.broadcast %cst_130 : f32 to vector<8x32xf32>
    %487 = arith.mulf %486, %485 : vector<8x32xf32>
    %488 = vector.extract_strided_slice %465 {offsets = [0, 64], sizes = [8, 32], strides = [1, 1]} : vector<8x96xf32> to vector<8x32xf32>
    %489 = vector.extract_strided_slice %467 {offsets = [0, 64], sizes = [8, 32], strides = [1, 1]} : vector<8x96xf32> to vector<8x32xf32>
    %490 = arith.addf %489, %293 : vector<8x32xf32>
    %491 = arith.mulf %477, %490 : vector<8x32xf32>
    %492 = arith.addf %488, %491 : vector<8x32xf32>
    %493 = math.tanh %492 : vector<8x32xf32>
    %cst_131 = arith.constant 1.000000e+00 : f32
    %494 = vector.broadcast %cst_131 : f32 to vector<8x32xf32>
    %495 = arith.subf %494, %487 : vector<8x32xf32>
    %496 = arith.mulf %495, %493 : vector<8x32xf32>
    %497 = arith.mulf %487, %464 : vector<8x32xf32>
    %498 = arith.addf %496, %497 : vector<8x32xf32>
    %499 = vector.extract_strided_slice %291 {offsets = [48, 0], sizes = [8, 96], strides = [1, 1]} : vector<64x96xf32> to vector<8x96xf32>
    %500 = arith.truncf %498 : vector<8x32xf32> to vector<8x32xbf16>
    %cst_132 = arith.constant dense<0.000000e+00> : vector<8x96xf32>
    %501 = tpu.matmul %500, %286, %cst_132 {dimension_numbers = #tpu.dot_dimension_numbers<[1], [0], [0], [1], [0, 0, 1, 1], [], []>} : vector<8x32xbf16>, vector<32x96xbf16>, vector<8x96xf32> -> vector<8x96xf32>
    %502 = vector.extract_strided_slice %499 {offsets = [0, 0], sizes = [8, 32], strides = [1, 1]} : vector<8x96xf32> to vector<8x32xf32>
    %503 = vector.extract_strided_slice %501 {offsets = [0, 0], sizes = [8, 32], strides = [1, 1]} : vector<8x96xf32> to vector<8x32xf32>
    %504 = arith.addf %502, %503 : vector<8x32xf32>
    %cst_133 = arith.constant 5.000000e-01 : f32
    %505 = vector.broadcast %cst_133 : f32 to vector<8x32xf32>
    %506 = arith.mulf %505, %504 : vector<8x32xf32>
    %507 = math.tanh %506 : vector<8x32xf32>
    %cst_134 = arith.constant 1.000000e+00 : f32
    %508 = vector.broadcast %cst_134 : f32 to vector<8x32xf32>
    %509 = arith.addf %507, %508 : vector<8x32xf32>
    %cst_135 = arith.constant 5.000000e-01 : f32
    %510 = vector.broadcast %cst_135 : f32 to vector<8x32xf32>
    %511 = arith.mulf %510, %509 : vector<8x32xf32>
    %512 = vector.extract_strided_slice %499 {offsets = [0, 32], sizes = [8, 32], strides = [1, 1]} : vector<8x96xf32> to vector<8x32xf32>
    %513 = vector.extract_strided_slice %501 {offsets = [0, 32], sizes = [8, 32], strides = [1, 1]} : vector<8x96xf32> to vector<8x32xf32>
    %514 = arith.addf %512, %513 : vector<8x32xf32>
    %cst_136 = arith.constant 5.000000e-01 : f32
    %515 = vector.broadcast %cst_136 : f32 to vector<8x32xf32>
    %516 = arith.mulf %515, %514 : vector<8x32xf32>
    %517 = math.tanh %516 : vector<8x32xf32>
    %cst_137 = arith.constant 1.000000e+00 : f32
    %518 = vector.broadcast %cst_137 : f32 to vector<8x32xf32>
    %519 = arith.addf %517, %518 : vector<8x32xf32>
    %cst_138 = arith.constant 5.000000e-01 : f32
    %520 = vector.broadcast %cst_138 : f32 to vector<8x32xf32>
    %521 = arith.mulf %520, %519 : vector<8x32xf32>
    %522 = vector.extract_strided_slice %499 {offsets = [0, 64], sizes = [8, 32], strides = [1, 1]} : vector<8x96xf32> to vector<8x32xf32>
    %523 = vector.extract_strided_slice %501 {offsets = [0, 64], sizes = [8, 32], strides = [1, 1]} : vector<8x96xf32> to vector<8x32xf32>
    %524 = arith.addf %523, %293 : vector<8x32xf32>
    %525 = arith.mulf %511, %524 : vector<8x32xf32>
    %526 = arith.addf %522, %525 : vector<8x32xf32>
    %527 = math.tanh %526 : vector<8x32xf32>
    %cst_139 = arith.constant 1.000000e+00 : f32
    %528 = vector.broadcast %cst_139 : f32 to vector<8x32xf32>
    %529 = arith.subf %528, %521 : vector<8x32xf32>
    %530 = arith.mulf %529, %527 : vector<8x32xf32>
    %531 = arith.mulf %521, %498 : vector<8x32xf32>
    %532 = arith.addf %530, %531 : vector<8x32xf32>
    %533 = vector.extract_strided_slice %291 {offsets = [56, 0], sizes = [8, 96], strides = [1, 1]} : vector<64x96xf32> to vector<8x96xf32>
    %534 = arith.truncf %532 : vector<8x32xf32> to vector<8x32xbf16>
    %cst_140 = arith.constant dense<0.000000e+00> : vector<8x96xf32>
    %535 = tpu.matmul %534, %286, %cst_140 {dimension_numbers = #tpu.dot_dimension_numbers<[1], [0], [0], [1], [0, 0, 1, 1], [], []>} : vector<8x32xbf16>, vector<32x96xbf16>, vector<8x96xf32> -> vector<8x96xf32>
    %536 = vector.extract_strided_slice %533 {offsets = [0, 0], sizes = [8, 32], strides = [1, 1]} : vector<8x96xf32> to vector<8x32xf32>
    %537 = vector.extract_strided_slice %535 {offsets = [0, 0], sizes = [8, 32], strides = [1, 1]} : vector<8x96xf32> to vector<8x32xf32>
    %538 = arith.addf %536, %537 : vector<8x32xf32>
    %cst_141 = arith.constant 5.000000e-01 : f32
    %539 = vector.broadcast %cst_141 : f32 to vector<8x32xf32>
    %540 = arith.mulf %539, %538 : vector<8x32xf32>
    %541 = math.tanh %540 : vector<8x32xf32>
    %cst_142 = arith.constant 1.000000e+00 : f32
    %542 = vector.broadcast %cst_142 : f32 to vector<8x32xf32>
    %543 = arith.addf %541, %542 : vector<8x32xf32>
    %cst_143 = arith.constant 5.000000e-01 : f32
    %544 = vector.broadcast %cst_143 : f32 to vector<8x32xf32>
    %545 = arith.mulf %544, %543 : vector<8x32xf32>
    %546 = vector.extract_strided_slice %533 {offsets = [0, 32], sizes = [8, 32], strides = [1, 1]} : vector<8x96xf32> to vector<8x32xf32>
    %547 = vector.extract_strided_slice %535 {offsets = [0, 32], sizes = [8, 32], strides = [1, 1]} : vector<8x96xf32> to vector<8x32xf32>
    %548 = arith.addf %546, %547 : vector<8x32xf32>
    %cst_144 = arith.constant 5.000000e-01 : f32
    %549 = vector.broadcast %cst_144 : f32 to vector<8x32xf32>
    %550 = arith.mulf %549, %548 : vector<8x32xf32>
    %551 = math.tanh %550 : vector<8x32xf32>
    %cst_145 = arith.constant 1.000000e+00 : f32
    %552 = vector.broadcast %cst_145 : f32 to vector<8x32xf32>
    %553 = arith.addf %551, %552 : vector<8x32xf32>
    %cst_146 = arith.constant 5.000000e-01 : f32
    %554 = vector.broadcast %cst_146 : f32 to vector<8x32xf32>
    %555 = arith.mulf %554, %553 : vector<8x32xf32>
    %556 = vector.extract_strided_slice %533 {offsets = [0, 64], sizes = [8, 32], strides = [1, 1]} : vector<8x96xf32> to vector<8x32xf32>
    %557 = vector.extract_strided_slice %535 {offsets = [0, 64], sizes = [8, 32], strides = [1, 1]} : vector<8x96xf32> to vector<8x32xf32>
    %558 = arith.addf %557, %293 : vector<8x32xf32>
    %559 = arith.mulf %545, %558 : vector<8x32xf32>
    %560 = arith.addf %556, %559 : vector<8x32xf32>
    %561 = math.tanh %560 : vector<8x32xf32>
    %cst_147 = arith.constant 1.000000e+00 : f32
    %562 = vector.broadcast %cst_147 : f32 to vector<8x32xf32>
    %563 = arith.subf %562, %555 : vector<8x32xf32>
    %564 = arith.mulf %563, %561 : vector<8x32xf32>
    %565 = arith.mulf %555, %532 : vector<8x32xf32>
    %566 = arith.addf %564, %565 : vector<8x32xf32>
    %567 = tpu.concatenate %328, %362, %396, %430, %464, %498, %532, %566 in 0 : vector<8x32xf32>, vector<8x32xf32>, vector<8x32xf32>, vector<8x32xf32>, vector<8x32xf32>, vector<8x32xf32>, vector<8x32xf32>, vector<8x32xf32> -> vector<64x32xf32>
    %568 = arith.truncf %567 : vector<64x32xf32> to vector<64x32xbf16>
    %c0_148 = arith.constant 0 : index
    %c0_149 = arith.constant 0 : index
    %569 = vector.load %arg9[%c0_148, %c0_149] : memref<32x32xbf16, #tpu.memory_space<vmem>>, vector<32x32xbf16>
    %cst_150 = arith.constant dense<0.000000e+00> : vector<64x32xf32>
    %570 = tpu.matmul %568, %569, %cst_150 {dimension_numbers = #tpu.dot_dimension_numbers<[1], [0], [0], [1], [0, 0, 1, 1], [], []>} : vector<64x32xbf16>, vector<32x32xbf16>, vector<64x32xf32> -> vector<64x32xf32>
    %c0_151 = arith.constant 0 : index
    %c0_152 = arith.constant 0 : index
    %571 = vector.load %arg10[%c0_151, %c0_152] : memref<1x32xf32, #tpu.memory_space<vmem>>, vector<1x32xf32>
    %572 = vector.broadcast %571 : vector<1x32xf32> to vector<64x32xf32>
    %573 = arith.addf %570, %572 : vector<64x32xf32>
    %cst_153 = arith.constant 5.000000e-01 : f32
    %574 = vector.broadcast %cst_153 : f32 to vector<64x32xf32>
    %575 = arith.mulf %574, %573 : vector<64x32xf32>
    %576 = math.tanh %575 : vector<64x32xf32>
    %cst_154 = arith.constant 1.000000e+00 : f32
    %577 = vector.broadcast %cst_154 : f32 to vector<64x32xf32>
    %578 = arith.addf %576, %577 : vector<64x32xf32>
    %cst_155 = arith.constant 5.000000e-01 : f32
    %579 = vector.broadcast %cst_155 : f32 to vector<64x32xf32>
    %580 = arith.mulf %579, %578 : vector<64x32xf32>
    %c0_156 = arith.constant 0 : index
    %c0_157 = arith.constant 0 : index
    %581 = vector.load %arg11[%c0_156, %c0_157] : memref<64x32xf32, #tpu.memory_space<vmem>>, vector<64x32xf32>
    tpu.vector_store %arg11[%c0_156, %c0_157], %580 {strides = array<i32>} : memref<64x32xf32, #tpu.memory_space<vmem>>, vector<64x32xf32>,
    return
  }
}

</mosaic_0001>

<bundles_post_ra>
// kernel: tpu_custom_call.1
= control target key start
LH: loop header
LB: loop body
LE: loop exit
PB: predicated region body
PF: predicated region fallthrough
CT: control target
= control target key end

     0   :  { %16 = vsyncpa [#allocation3], 0  ;;  %s1951_s0 = inlined_call_operand.vmem [shape: bf16[64,16], index: 0, kind: input, shape index: {}]   ;;  %s1952_s1 = inlined_call_operand.hbm [shape: bf16[16,96], index: 1, kind: input, shape index: {}]   ;;  %s1953_s2 = inlined_call_operand.vmem [shape: bf16[32,96], index: 2, kind: input, shape index: {}]   ;;  %s1954_s3 = inlined_call_operand.hbm [shape: f32[1,96], index: 3, kind: input, shape index: {}]   ;;  %s1955_s4 = inlined_call_operand.hbm [shape: f32[1,32], index: 4, kind: input, shape index: {}]   ;;  %s1956_s5 = inlined_call_operand.vmem [shape: bf16[32,96], index: 5, kind: input, shape index: {}]   ;;  %s1957_s6 = inlined_call_operand.hbm [shape: bf16[32,96], index: 6, kind: input, shape index: {}]   ;;  %s1958_s7 = inlined_call_operand.hbm [shape: f32[1,96], index: 7, kind: input, shape index: {}]   ;;  %s1959_s8 = inlined_call_operand.hbm [shape: f32[1,32], index: 8, kind: input, shape index: {}]   ;;  %s1960_s9 = inlined_call_operand.vmem [shape: bf16[32,32], index: 9, kind: input, shape index: {}]   ;;  %s1961_s10 = inlined_call_operand.vmem [shape: f32[1,32], index: 10, kind: input, shape index: {}]   ;;  %s1962_s11 = inlined_call_operand.vmem [shape: f32[64,32], index: 11, kind: output, shape index: {}]  }
   0x1   :  { %17 = vsyncpa [#allocation5], 0 }
   0x2   :  { %18 = vsyncpa [#allocation8], 0  ;;  %s42_s19 = sshll.u32 %s1954_s3, 4  ;;  %s43_s19 = int_to_ptr.hbm [resolvable:$true] %s42_s19 }
   0x3   :  { %19 = vsyncpa [#allocation11], 0  ;;  %s1504_s20 = smov [#allocation4]   ;;  %s65_s24 = sshll.u32 %s1957_s6, 4  ;;  %s66_s24 = int_to_ptr.hbm [resolvable:$true] %s65_s24 }
   0x4   :  { %s44_s21 = sshll.u32 %s1504_s20, 4  ;;  %s1505_s25 = smov [#allocation7]   ;;  %s45_s21 = int_to_ptr.vmem [resolvable:$true] %s44_s21 }
   0x5   :  { %47 = dma.hbm_to_vmem [thread:$0]  %s43_s19, 16, %s45_s21, [#allocation5]  }
   0x6   :  { %s67_s26 = sshll.u32 %s1505_s25, 4  ;;  %s26_s29 = sshll.u32 %s1952_s1, 4  ;;  %s68_s26 = int_to_ptr.vmem [resolvable:$true] %s67_s26  ;;  %s27_s29 = int_to_ptr.hbm [resolvable:$true] %s26_s29 }
   0x7   :  { %s1506_s3 = smov 64   ;;  %s1507_s30 = smov 4  }
   0x8   :  { %73 = dma.hbm_to_vmem [thread:$0]  %s66_s24, 256, %s68_s26, [#allocation8], %s1506_s3, %s1506_s3, %s1507_s30  }
   0x9   :  { %s53_s14 = sshll.u32 %s1955_s4, 4  ;;  %s1508_s15 = smov [#allocation2]   ;;  %s54_s14 = int_to_ptr.hbm [resolvable:$true] %s53_s14 }
   0xa   :  { %s28_s6 = sshll.u32 %s1508_s15, 4  ;;  %s1509_s16 = smov [#allocation6]   ;;  %s29_s6 = int_to_ptr.vmem [resolvable:$true] %s28_s6 }
   0xb   :  { %34 = dma.hbm_to_vmem [thread:$0]  %s27_s29, 128, %s29_s6, [#allocation3], %s1506_s3, %s1506_s3, %s1507_s30  }
   0xc   :  { %s55_s1 = sshll.u32 %s1509_s16, 4  ;;  %s79_s19 = sshll.u32 %s1958_s7, 4  ;;  %s56_s1 = int_to_ptr.vmem [resolvable:$true] %s55_s1  ;;  %s80_s19 = int_to_ptr.hbm [resolvable:$true] %s79_s19 }
   0xd   :  { %58 = dma.hbm_to_vmem [thread:$0]  %s54_s14, 16, %s56_s1, [#allocation5]  }
   0xe   :  { %s90_s4 = sshll.u32 %s1959_s8, 4  ;;  %s1510_s22 = smov [#allocation9]   ;;  %s91_s4 = int_to_ptr.hbm [resolvable:$true] %s90_s4 }
   0xf   :  { %s81_s23 = sshll.u32 %s1510_s22, 4  ;;  %s1511_s24 = smov [#allocation10]   ;;  %s82_s23 = int_to_ptr.vmem [resolvable:$true] %s81_s23 }
  0x10   :  { %84 = dma.hbm_to_vmem [thread:$0]  %s80_s19, 16, %s82_s23, [#allocation8]  }
  0x11   :  { %s92_s25 = sshll.u32 %s1511_s24, 4  ;;  %s93_s25 = int_to_ptr.vmem [resolvable:$true] %s92_s25 }
  0x12   :  { %95 = dma.hbm_to_vmem [thread:$0]  %s91_s4, 16, %s93_s25, [#allocation11]  }
  0x13   :  { %1496 = dma.done.wait [#allocation3], 128  }
  0x14   :  { %1497 = vsyncadd [#allocation3], 4294967168 }
  0x15   :  { %1498 = dma.done.wait [#allocation5], 32  }
  0x16   :  { %1499 = vsyncadd [#allocation5], 4294967264 }
  0x17   :  { %1500 = dma.done.wait [#allocation8], 272  }
  0x18   :  { %1501 = vsyncadd [#allocation8], 4294967024 }
  0x19   :  { %1502 = dma.done.wait [#allocation11], 16  }
  0x1a   :  { %1503 = vsyncadd [#allocation11], 4294967280  ;;  %v1245_v0 = vld [vmem:[#allocation2] sm:$0xff]  ;;  %v1599_v1 = vld [vmem:[%s1953_s2 + $0x8] sm:$0xff]  ;;  %vm170_vm0 = vcmask 130048   ;;  %v1512_v6 = vmov 0  }
  0x1b   :  { %v1242_v2 = vld [vmem:[%s1951_s0 + $0x8] sm:$0xff]  ;;  %v1241_v3 = vld [vmem:[%s1951_s0] sm:$0xff]  ;;  %1254 = vmatpush.bf16.msra.mxu1 %v1245_v0  ;;  %190 = vmatpush.bf16.msra.mxu0 %v1245_v0  ;;  %v1243_v26 = vld [vmem:[%s1951_s0 + $0x10] sm:$0xff]  ;;  %vm226_vm1 = vcmask 261120  }
  0x1c   :  { %v1610_v4 = vld [vmem:[%s1953_s2] sm:$0xff]  ;;  %v1267_v5 = vld [vmem:[#allocation6] ss:$0 sm:$0xff]  ;;  %1255 = vmatpush.bf16.msra.mxu2 %v1245_v0  ;;  %1256 = vmatpush.bf16.msra.mxu3 %v1245_v0  ;;  %v1634_v14 = vld [vmem:[#allocation4] ss:$0 sm:$0xff]  ;;  %s1513_s2 = smov 96  }
  0x1d   :  { %248 = vrot.lane.b32.xlu0 %v1267_v5, %s1506_s3  ;;  %v1244_v51 = vld [vmem:[%s1951_s0 + $0x18] sm:$0xff] }
  0x1e   :  { %1184 = vmatmul.msk.bf16.vlgmr.msra.gmra.mxu1 %vm170_vm0, %v1242_v2  ;;  %1183 = vmatmul.msk.bf16.vlgmr.msra.gmra.mxu0 %vm170_vm0, %v1241_v3 }
  0x1f   :  { %236 = vmatpush.bf16.msrb.mxu1 %v1599_v1  ;;  %1185 = vmatmul.msk.bf16.vlgmr.msra.gmra.mxu2 %vm170_vm0, %v1243_v26 }
  0x20   :  { %284 = vmatpush.bf16.msrb.mxu2 %v1599_v1  ;;  %329 = vmatpush.bf16.msrb.mxu3 %v1599_v1 }
  0x21   :  { %1186 = vmatmul.msk.bf16.vlgmr.msra.gmra.mxu3 %vm170_vm0, %v1244_v51 }
  0x23   :  { %237 = vmatpush.bf16.msrb.mxu1 %v1610_v4 }
  0x24   :  { %285 = vmatpush.bf16.msrb.mxu2 %v1610_v4  ;;  %330 = vmatpush.bf16.msrb.mxu3 %v1610_v4 }
  0x27   :  { %374 = vmatpush.bf16.msra.mxu1 %v1599_v1 }
  0x28   :  { %419 = vmatpush.bf16.msra.mxu2 %v1599_v1  ;;  %464 = vmatpush.bf16.msra.mxu3 %v1599_v1 }
  0x2b   :  { %375 = vmatpush.bf16.msra.mxu1 %v1610_v4 }
  0x2c   :  { %420 = vmatpush.bf16.msra.mxu2 %v1610_v4  ;;  %465 = vmatpush.bf16.msra.mxu3 %v1610_v4 }
  0x2e   :  { %238 = vmatmul.bf16.vlgmr.msrb.gmra.mxu1 %v1512_v6 }
  0x2f   :  { %509 = vmatpush.bf16.msrb.mxu1 %v1599_v1 }
  0x33   :  { %510 = vmatpush.bf16.msrb.mxu1 %v1610_v4 }
  0x8f   :  { %v1630_v9 = vpop.permute.xlu0 %248 }
  0x9b   :  { %v1626_v7 = vpop.f32.mrf.mxu1  ;;  %v192_v13 = vpop.f32.mrf.mxu0 }
  0x9c   :  { %v193_v15 = vadd.f32 %v1634_v14, %v192_v13  ;;  %v198_v0 = vadd.f32 %v1634_v14, %v1626_v7 }
  0xa2   :  { %v1653_v34 = vpop.f32.mrf.mxu2 }
  0xa3   :  { %v1628_v8 = vpop.f32.mrf.mxu1  ;;  %v194_v39 = vpop.f32.mrf.mxu0 }
  0xa4   :  { %v195_v40 = vadd.f32 %v1634_v14, %v194_v39  ;;  %v1675_v59 = vpop.f32.mrf.mxu3 }
  0xaa   :  { %v1655_v35 = vpop.f32.mrf.mxu2 }
  0xab   :  { %v239_v10 = vpop.f32.mrf.mxu1 }
  0xac   :  { %v251_v11 = vadd.f32 %v1630_v9, %v239_v10  ;;  %v243_v16 = vadd.f32 %v239_v10, %v193_v15  ;;  %v1677_v60 = vpop.f32.mrf.mxu3 }
  0xae   :  { %253 = vrot.lane.b32.xlu0 %v251_v11, %s1506_s3  ;;  %v244_v17 = vmul.f32 0.5, %v243_v16 }
  0xb0   :  { %1272 = vtanh.f32 %v244_v17 }
  0xb3   :  { %v241_v12 = vpop.f32.mrf.mxu1 }
  0xb6   :  { %v1273_v18 = vpop.eup %1272 }
  0xb7   :  { %v246_v19 = vadd.f32 1.0, %v1273_v18 }
  0xb9   :  { %v247_v20 = vmul.f32 0.5, %v246_v19 }
  0xbb   :  { %v263_v27 = vsub.f32 1.0, %v247_v20  ;;  %v269_v29 = vmul.f32 0.0, %v247_v20 }
 0x120   :  { %v254_v21 = vpop.permute.xlu0 %253 }
 0x121   :  { %v256_v22 = vmul.f32 %v254_v21, %v247_v20 }
 0x123   :  { %258 = vrot.lane.b32.xlu1 %v256_v22, %s1506_s3 }
 0x195   :  { %v259_v23 = vpop.permute.xlu1 %258 }
 0x196   :  { %v261_v24 = vadd.f32 %v259_v23, %v193_v15 }
 0x198   :  { %1274 = vtanh.f32 %v261_v24 }
 0x19e   :  { %v1275_v25 = vpop.eup %1274 }
 0x19f   :  { %265 = vrot.lane.b32.xlu1 %v1275_v25, %s1513_s2  ;;  %v200_v25 = vadd.f32 %v1634_v14, %v1628_v8 }
 0x211   :  { %v266_v28 = vpop.permute.xlu1 %265 }
 0x212   :  { %v268_v30 = vmul.f32 %v266_v28, %v263_v27 }
 0x214   :  { %v1645_v31 = vadd.f32 %v269_v29, %v268_v30 }
 0x216   :  { %v271_v32 = vpack.c.bf16 %v1645_v31, %v1645_v31 }
 0x218   :  { %273 = vrot.lane.b32.xlu2 %v271_v32, %s1513_s2 }
 0x272   :  { %v274_v33 = vpop.permute.xlu2 %273 }
 0x273   :  { %1195 = vmatmul.msk.bf16.vlgmr.msrb.gmra.mxu2 %vm226_vm1, %v274_v33 }
 0x274   :  { %554 = vmatpush.bf16.msrb.mxu2 %v1599_v1 }
 0x278   :  { %555 = vmatpush.bf16.msrb.mxu2 %v1610_v4 }
 0x2f6   :  { %v287_v36 = vpop.f32.mrf.mxu2 }
 0x2f7   :  { %v296_v37 = vadd.f32 %v287_v36, %v1630_v9  ;;  %v291_v41 = vadd.f32 %v287_v36, %v195_v40 }
 0x2f9   :  { %298 = vrot.lane.b32.xlu2 %v296_v37, %s1506_s3  ;;  %v292_v42 = vmul.f32 0.5, %v291_v41 }
 0x2fb   :  { %1276 = vtanh.f32 %v292_v42 }
 0x2fe   :  { %v289_v38 = vpop.f32.mrf.mxu2 }
 0x301   :  { %v1277_v43 = vpop.eup %1276 }
 0x302   :  { %v294_v44 = vadd.f32 1.0, %v1277_v43 }
 0x304   :  { %v295_v45 = vmul.f32 0.5, %v294_v44 }
 0x306   :  { %v308_v52 = vsub.f32 1.0, %v295_v45  ;;  %v314_v54 = vmul.f32 %v295_v45, %v1645_v31 }
 0x353   :  { %v299_v46 = vpop.permute.xlu2 %298 }
 0x354   :  { %v301_v47 = vmul.f32 %v299_v46, %v295_v45 }
 0x356   :  { %303 = vrot.lane.b32.xlu0 %v301_v47, %s1506_s3 }
 0x3c8   :  { %v304_v48 = vpop.permute.xlu0 %303 }
 0x3c9   :  { %v306_v49 = vadd.f32 %v304_v48, %v195_v40  ;;  %v203_v48 = vadd.f32 %v1634_v14, %v1653_v34 }
 0x3cb   :  { %1278 = vtanh.f32 %v306_v49 }
 0x3d1   :  { %v1279_v50 = vpop.eup %1278 }
 0x3d2   :  { %310 = vrot.lane.b32.xlu1 %v1279_v50, %s1513_s2 }
 0x444   :  { %v311_v53 = vpop.permute.xlu1 %310 }
 0x445   :  { %v313_v55 = vmul.f32 %v311_v53, %v308_v52 }
 0x447   :  { %v1669_v56 = vadd.f32 %v314_v54, %v313_v55 }
 0x449   :  { %v316_v57 = vpack.c.bf16 %v1669_v56, %v1669_v56 }
 0x44b   :  { %318 = vrot.lane.b32.xlu2 %v316_v57, %s1513_s2 }
 0x4a5   :  { %v319_v58 = vpop.permute.xlu2 %318 }
 0x4a6   :  { %1196 = vmatmul.msk.bf16.vlgmr.msrb.gmra.mxu3 %vm226_vm1, %v319_v58 }
 0x529   :  { %v332_v61 = vpop.f32.mrf.mxu3 }
 0x52a   :  { %v341_v62 = vadd.f32 %v332_v61, %v1630_v9  ;;  %v336_v1 = vadd.f32 %v332_v61, %v198_v0 }
 0x52c   :  { %343 = vrot.lane.b32.xlu0 %v341_v62, %s1506_s3  ;;  %v337_v2 = vmul.f32 0.5, %v336_v1 }
 0x52e   :  { %1280 = vtanh.f32 %v337_v2 }
 0x531   :  { %v334_v63 = vpop.f32.mrf.mxu3 }
 0x534   :  { %v1281_v3 = vpop.eup %1280 }
 0x535   :  { %v339_v4 = vadd.f32 1.0, %v1281_v3 }
 0x537   :  { %v340_v5 = vmul.f32 0.5, %v339_v4 }
 0x539   :  { %v353_v16 = vsub.f32 1.0, %v340_v5  ;;  %v359_v7 = vmul.f32 %v340_v5, %v1669_v56 }
 0x59e   :  { %v344_v10 = vpop.permute.xlu0 %343 }
 0x59f   :  { %v346_v11 = vmul.f32 %v344_v10, %v340_v5 }
 0x5a1   :  { %348 = vrot.lane.b32.xlu1 %v346_v11, %s1506_s3  ;;  %v205_v11 = vadd.f32 %v1634_v14, %v1655_v35  ;;  %v1248_v35 = vld [vmem:[%s1956_s5] sm:$0xff] }
 0x613   :  { %v349_v12 = vpop.permute.xlu1 %348 }
 0x614   :  { %v351_v13 = vadd.f32 %v349_v12, %v198_v0 }
 0x616   :  { %1282 = vtanh.f32 %v351_v13 }
 0x61c   :  { %v1283_v15 = vpop.eup %1282 }
 0x61d   :  { %355 = vrot.lane.b32.xlu2 %v1283_v15, %s1513_s2 }
 0x677   :  { %v356_v17 = vpop.permute.xlu2 %355 }
 0x678   :  { %v358_v18 = vmul.f32 %v356_v17, %v353_v16 }
 0x67a   :  { %v1686_v19 = vadd.f32 %v359_v7, %v358_v18 }
 0x67c   :  { %v361_v20 = vpack.c.bf16 %v1686_v19, %v1686_v19 }
 0x67e   :  { %363 = vrot.lane.b32.xlu0 %v361_v20, %s1513_s2  ;;  %v586_v20 = vpack.c.bf16 %v1669_v56, %v1645_v31 }
 0x6f0   :  { %v364_v21 = vpop.permute.xlu0 %363 }
 0x6f1   :  { %1197 = vmatmul.msk.bf16.vlgmr.msra.gmra.mxu1 %vm226_vm1, %v364_v21  ;;  %v1249_v21 = vld [vmem:[%s1956_s5 + $0x8] sm:$0xff] }
 0x6f2   :  { %645 = vmatpush.bf16.msrb.mxu3 %v1249_v21 }
 0x6f6   :  { %646 = vmatpush.bf16.msrb.mxu3 %v1248_v35 }
 0x76e   :  { %v377_v22 = vpop.f32.mrf.mxu1 }
 0x76f   :  { %v386_v23 = vadd.f32 %v377_v22, %v1630_v9  ;;  %v381_v26 = vadd.f32 %v377_v22, %v200_v25 }
 0x771   :  { %388 = vrot.lane.b32.xlu1 %v386_v23, %s1506_s3  ;;  %v382_v27 = vmul.f32 0.5, %v381_v26 }
 0x773   :  { %1284 = vtanh.f32 %v382_v27 }
 0x776   :  { %v379_v24 = vpop.f32.mrf.mxu1 }
 0x779   :  { %v1285_v28 = vpop.eup %1284 }
 0x77a   :  { %v384_v29 = vadd.f32 1.0, %v1285_v28 }
 0x77c   :  { %v385_v30 = vmul.f32 0.5, %v384_v29 }
 0x77e   :  { %v398_v39 = vsub.f32 1.0, %v385_v30  ;;  %v404_v8 = vmul.f32 %v385_v30, %v1686_v19 }
 0x7e3   :  { %v389_v32 = vpop.permute.xlu1 %388 }
 0x7e4   :  { %v391_v33 = vmul.f32 %v389_v32, %v385_v30  ;;  %v1740_v30 = vld [vmem:[#allocation7 + $0x8] sm:$0xff]  ;;  %v1743_v32 = vld [vmem:[#allocation7] sm:$0xff] }
 0x7e5   :  { %688 = vmatpush.bf16.msra.mxu1 %v1740_v30  ;;  %781 = vmatpush.bf16.msrb.mxu0 %v1740_v30 }
 0x7e6   :  { %393 = vrot.lane.b32.xlu2 %v391_v33, %s1506_s3  ;;  %v1270_v33 = vld [vmem:[#allocation10] ss:$0 sm:$0xff] }
 0x7e9   :  { %689 = vmatpush.bf16.msra.mxu1 %v1743_v32  ;;  %782 = vmatpush.bf16.msrb.mxu0 %v1743_v32 }
 0x7ed   :  { %916 = vmatpush.bf16.msra.mxu0 %v1740_v30 }
 0x7f1   :  { %917 = vmatpush.bf16.msra.mxu0 %v1743_v32 }
 0x840   :  { %v394_v36 = vpop.permute.xlu2 %393 }
 0x841   :  { %v396_v37 = vadd.f32 %v394_v36, %v200_v25 }
 0x843   :  { %1286 = vtanh.f32 %v396_v37 }
 0x849   :  { %v1287_v38 = vpop.eup %1286 }
 0x84a   :  { %400 = vrot.lane.b32.xlu0 %v1287_v38, %s1513_s2 }
 0x8bc   :  { %v401_v40 = vpop.permute.xlu0 %400 }
 0x8bd   :  { %v403_v41 = vmul.f32 %v401_v40, %v398_v39 }
 0x8bf   :  { %v1699_v42 = vadd.f32 %v404_v8, %v403_v41 }
 0x8c1   :  { %v406_v43 = vpack.c.bf16 %v1699_v42, %v1699_v42 }
 0x8c3   :  { %408 = vrot.lane.b32.xlu1 %v406_v43, %s1513_s2 }
 0x935   :  { %v409_v44 = vpop.permute.xlu1 %408 }
 0x936   :  { %1198 = vmatmul.msk.bf16.vlgmr.msra.gmra.mxu2 %vm226_vm1, %v409_v44 }
 0x937   :  { %736 = vmatpush.bf16.msra.mxu2 %v1740_v30 }
 0x93b   :  { %737 = vmatpush.bf16.msra.mxu2 %v1743_v32 }
 0x9b9   :  { %v422_v45 = vpop.f32.mrf.mxu2 }
 0x9ba   :  { %v431_v46 = vadd.f32 %v422_v45, %v1630_v9  ;;  %v426_v49 = vadd.f32 %v422_v45, %v203_v48 }
 0x9bc   :  { %433 = vrot.lane.b32.xlu2 %v431_v46, %s1506_s3  ;;  %v427_v50 = vmul.f32 0.5, %v426_v49  ;;  %v1767_v46 = vld [vmem:[#allocation9] ss:$0 sm:$0xff] }
 0x9be   :  { %1288 = vtanh.f32 %v427_v50 }
 0x9c1   :  { %v424_v47 = vpop.f32.mrf.mxu2 }
 0x9c4   :  { %v1289_v51 = vpop.eup %1288 }
 0x9c5   :  { %v429_v52 = vadd.f32 1.0, %v1289_v51 }
 0x9c7   :  { %v430_v53 = vmul.f32 0.5, %v429_v52 }
 0x9c9   :  { %v443_v62 = vsub.f32 1.0, %v430_v53  ;;  %v449_v34 = vmul.f32 %v430_v53, %v1699_v42 }
 0xa16   :  { %v434_v54 = vpop.permute.xlu2 %433 }
 0xa17   :  { %v436_v55 = vmul.f32 %v434_v54, %v430_v53 }
 0xa19   :  { %438 = vrot.lane.b32.xlu0 %v436_v55, %s1506_s3 }
 0xa8b   :  { %v439_v57 = vpop.permute.xlu0 %438 }
 0xa8c   :  { %v441_v58 = vadd.f32 %v439_v57, %v203_v48 }
 0xa8e   :  { %1290 = vtanh.f32 %v441_v58 }
 0xa94   :  { %v1291_v61 = vpop.eup %1290 }
 0xa95   :  { %445 = vrot.lane.b32.xlu1 %v1291_v61, %s1513_s2 }
 0xb07   :  { %v446_v63 = vpop.permute.xlu1 %445 }
 0xb08   :  { %v448_v0 = vmul.f32 %v446_v63, %v443_v62 }
 0xb0a   :  { %v1712_v1 = vadd.f32 %v449_v34, %v448_v0 }
 0xb0c   :  { %v451_v2 = vpack.c.bf16 %v1712_v1, %v1712_v1 }
 0xb0e   :  { %453 = vrot.lane.b32.xlu2 %v451_v2, %s1513_s2 }
 0xb68   :  { %v454_v3 = vpop.permute.xlu2 %453 }
 0xb69   :  { %1199 = vmatmul.msk.bf16.vlgmr.msra.gmra.mxu3 %vm226_vm1, %v454_v3 }
 0xbec   :  { %v467_v4 = vpop.f32.mrf.mxu3 }
 0xbed   :  { %v476_v5 = vadd.f32 %v467_v4, %v1630_v9  ;;  %v471_v12 = vadd.f32 %v467_v4, %v205_v11 }
 0xbef   :  { %478 = vrot.lane.b32.xlu0 %v476_v5, %s1506_s3  ;;  %v472_v13 = vmul.f32 0.5, %v471_v12 }
 0xbf1   :  { %1292 = vtanh.f32 %v472_v13 }
 0xbf4   :  { %v469_v10 = vpop.f32.mrf.mxu3 }
 0xbf7   :  { %v1293_v15 = vpop.eup %1292 }
 0xbf8   :  { %v474_v16 = vadd.f32 1.0, %v1293_v15 }
 0xbfa   :  { %v475_v17 = vmul.f32 0.5, %v474_v16 }
 0xbfc   :  { %v488_v31 = vsub.f32 1.0, %v475_v17  ;;  %v494_v26 = vmul.f32 %v475_v17, %v1712_v1 }
 0xc61   :  { %v479_v7 = vpop.permute.xlu0 %478 }
 0xc62   :  { %v481_v18 = vmul.f32 %v479_v7, %v475_v17 }
 0xc64   :  { %483 = vrot.lane.b32.xlu1 %v481_v18, %s1506_s3 }
 0xc6c   :  { %607 = vrot.lane.b32.xlu1 %v586_v20, %s1513_s2 }
 0xcd6   :  { %v484_v22 = vpop.permute.xlu1 %483 }
 0xcd7   :  { %v486_v23 = vadd.f32 %v484_v22, %v205_v11 }
 0xcd9   :  { %1294 = vtanh.f32 %v486_v23 }
 0xcde   :  { %v608_v24 = vpop.permute.xlu1 %607 }
 0xcdf   :  { %v1295_v25 = vpop.eup %1294  ;;  %1210 = vmatmul.msk.bf16.vlgmr.msrb.gmra.mxu3 %vm226_vm1, %v608_v24 }
 0xce0   :  { %490 = vrot.lane.b32.xlu2 %v1295_v25, %s1513_s2 }
 0xce8   :  { %700 = vrot.lane.b32.xlu2 %v1270_v33, %s1506_s3 }
 0xd3a   :  { %v491_v56 = vpop.permute.xlu2 %490 }
 0xd3b   :  { %v493_v27 = vmul.f32 %v491_v56, %v488_v31 }
 0xd3d   :  { %v1735_v28 = vadd.f32 %v494_v26, %v493_v27 }
 0xd3f   :  { %v496_v29 = vpack.c.bf16 %v1735_v28, %v1735_v28 }
 0xd41   :  { %498 = vrot.lane.b32.xlu0 %v496_v29, %s1513_s2 }
 0xd42   :  { %v1761_v40 = vpop.permute.xlu2 %700 }
 0xd62   :  { %v648_v47 = vpop.f32.mrf.mxu3 }
 0xd63   :  { %v649_v49 = vadd.f32 %v1767_v46, %v648_v47 }
 0xd6a   :  { %v650_v26 = vpop.f32.mrf.mxu3 }
 0xd6b   :  { %v651_v27 = vadd.f32 %v1767_v46, %v650_v26 }
 0xdb3   :  { %v499_v36 = vpop.permute.xlu0 %498 }
 0xdb4   :  { %1200 = vmatmul.msk.bf16.vlgmr.msrb.gmra.mxu1 %vm226_vm1, %v499_v36 }
 0xdb5   :  { %826 = vmatpush.bf16.msrb.mxu1 %v1740_v30 }
 0xdb9   :  { %827 = vmatpush.bf16.msrb.mxu1 %v1743_v32 }
 0xdc4   :  { %690 = vmatmul.bf16.vlgmr.msra.gmra.mxu1 %v1512_v6  ;;  %v208_v6 = vadd.f32 %v1634_v14, %v1675_v59 }
 0xdc5   :  { %961 = vmatpush.bf16.msra.mxu1 %v1740_v30 }
 0xdc9   :  { %962 = vmatpush.bf16.msra.mxu1 %v1743_v32 }
 0xe31   :  { %v512_v37 = vpop.f32.mrf.mxu1 }
 0xe32   :  { %v521_v38 = vadd.f32 %v512_v37, %v1630_v9  ;;  %v516_v44 = vadd.f32 %v512_v37, %v208_v6 }
 0xe34   :  { %523 = vrot.lane.b32.xlu0 %v521_v38, %s1506_s3  ;;  %v517_v45 = vmul.f32 0.5, %v516_v44 }
 0xe36   :  { %1296 = vtanh.f32 %v517_v45 }
 0xe39   :  { %v514_v39 = vpop.f32.mrf.mxu1 }
 0xe3a   :  { %v587_v39 = vpack.c.bf16 %v1699_v42, %v1686_v19 }
 0xe3c   :  { %v1297_v48 = vpop.eup %1296 }
 0xe3d   :  { %v519_v51 = vadd.f32 1.0, %v1297_v48 }
 0xe3f   :  { %v520_v53 = vmul.f32 0.5, %v519_v51 }
 0xe41   :  { %v691_v8 = vpop.f32.mrf.mxu1  ;;  %v533_v5 = vsub.f32 1.0, %v520_v53  ;;  %v539_v11 = vmul.f32 %v520_v53, %v1735_v28 }
 0xe42   :  { %v703_v41 = vadd.f32 %v1761_v40, %v691_v8  ;;  %v695_v50 = vadd.f32 %v691_v8, %v649_v49 }
 0xe44   :  { %705 = vrot.lane.b32.xlu1 %v703_v41, %s1506_s3  ;;  %v696_v52 = vmul.f32 0.5, %v695_v50 }
 0xe46   :  { %1298 = vtanh.f32 %v696_v52 }
 0xe49   :  { %v693_v43 = vpop.f32.mrf.mxu1 }
 0xe4c   :  { %v1299_v57 = vpop.eup %1298 }
 0xe4d   :  { %v698_v59 = vadd.f32 1.0, %v1299_v57 }
 0xe4f   :  { %v699_v58 = vmul.f32 0.5, %v698_v59 }
 0xe51   :  { %v715_v16 = vsub.f32 1.0, %v699_v58  ;;  %v721_v7 = vmul.f32 0.0, %v699_v58 }
 0xea6   :  { %v524_v54 = vpop.permute.xlu0 %523 }
 0xea7   :  { %v526_v55 = vmul.f32 %v524_v54, %v520_v53 }
 0xea9   :  { %528 = vrot.lane.b32.xlu2 %v526_v55, %s1506_s3 }
 0xeb6   :  { %v706_v61 = vpop.permute.xlu1 %705 }
 0xeb7   :  { %v708_v62 = vmul.f32 %v706_v61, %v699_v58 }
 0xeb9   :  { %710 = vrot.lane.b32.xlu0 %v708_v62, %s1506_s3 }
 0xf03   :  { %v529_v63 = vpop.permute.xlu2 %528 }
 0xf04   :  { %v531_v34 = vadd.f32 %v529_v63, %v208_v6 }
 0xf06   :  { %1300 = vtanh.f32 %v531_v34 }
 0xf0c   :  { %v1301_v0 = vpop.eup %1300 }
 0xf0d   :  { %535 = vrot.lane.b32.xlu1 %v1301_v0, %s1513_s2 }
 0xf2b   :  { %v711_v2 = vpop.permute.xlu0 %710 }
 0xf2c   :  { %v713_v3 = vadd.f32 %v711_v2, %v649_v49 }
 0xf2e   :  { %1302 = vtanh.f32 %v713_v3 }
 0xf34   :  { %v1303_v4 = vpop.eup %1302 }
 0xf35   :  { %717 = vrot.lane.b32.xlu2 %v1303_v4, %s1513_s2 }
 0xf7f   :  { %v536_v10 = vpop.permute.xlu1 %535 }
 0xf80   :  { %v538_v12 = vmul.f32 %v536_v10, %v533_v5 }
 0xf82   :  { %v1775_v13 = vadd.f32 %v539_v11, %v538_v12 }
 0xf84   :  { %v541_v15 = vpack.c.bf16 %v1775_v13, %v1775_v13 }
 0xf86   :  { %543 = vrot.lane.b32.xlu0 %v541_v15, %s1513_s2 }
 0xf8f   :  { %v718_v17 = vpop.permute.xlu2 %717 }
 0xf90   :  { %v720_v18 = vmul.f32 %v718_v17, %v715_v16 }
 0xf92   :  { %v1780_v20 = vadd.f32 %v721_v7, %v720_v18 }
 0xf94   :  { %v723_v21 = vpack.c.bf16 %v1780_v20, %v1780_v20 }
 0xf96   :  { %725 = vrot.lane.b32.xlu1 %v723_v21, %s1513_s2 }
 0xff8   :  { %v544_v35 = vpop.permute.xlu0 %543 }
 0xff9   :  { %1201 = vmatmul.msk.bf16.vlgmr.msrb.gmra.mxu2 %vm226_vm1, %v544_v35 }
 0xffa   :  { %871 = vmatpush.bf16.msrb.mxu2 %v1740_v30 }
 0xffe   :  { %872 = vmatpush.bf16.msrb.mxu2 %v1743_v32 }
0x1008   :  { %v726_v22 = vpop.permute.xlu1 %725 }
0x1009   :  { %1222 = vmatmul.msk.bf16.vlgmr.msra.gmra.mxu2 %vm226_vm1, %v726_v22 }
0x100a   :  { %1006 = vmatpush.bf16.msra.mxu2 %v1740_v30 }
0x100e   :  { %1007 = vmatpush.bf16.msra.mxu2 %v1743_v32 }
0x107c   :  { %v1791_v23 = vpop.f32.mrf.mxu2 }
0x1084   :  { %v559_v24 = vpop.f32.mrf.mxu2 }
0x108c   :  { %v739_v25 = vpop.f32.mrf.mxu2 }
0x108d   :  { %v748_v31 = vadd.f32 %v739_v25, %v1761_v40  ;;  %v743_v29 = vadd.f32 %v739_v25, %v651_v27 }
0x108f   :  { %750 = vrot.lane.b32.xlu2 %v748_v31, %s1506_s3  ;;  %v744_v33 = vmul.f32 0.5, %v743_v29 }
0x1091   :  { %1304 = vtanh.f32 %v744_v33 }
0x1094   :  { %v741_v56 = vpop.f32.mrf.mxu2 }
0x1097   :  { %v1305_v36 = vpop.eup %1304 }
0x1098   :  { %v746_v37 = vadd.f32 1.0, %v1305_v36 }
0x109a   :  { %v747_v30 = vmul.f32 0.5, %v746_v37 }
0x109c   :  { %v760_v44 = vsub.f32 1.0, %v747_v30  ;;  %v766_v47 = vmul.f32 %v747_v30, %v1780_v20 }
0x10e9   :  { %v751_v38 = vpop.permute.xlu2 %750 }
0x10ea   :  { %v753_v32 = vmul.f32 %v751_v38, %v747_v30 }
0x10ec   :  { %755 = vrot.lane.b32.xlu0 %v753_v32, %s1506_s3 }
0x10f4   :  { %609 = vrot.lane.b32.xlu0 %v587_v39, %s1513_s2 }
0x115e   :  { %v756_v8 = vpop.permute.xlu0 %755 }
0x115f   :  { %v758_v41 = vadd.f32 %v756_v8, %v651_v27  ;;  %v588_v27 = vpack.c.bf16 %v1735_v28, %v1712_v1 }
0x1161   :  { %1306 = vtanh.f32 %v758_v41 }
0x1166   :  { %v610_v43 = vpop.permute.xlu0 %609 }
0x1167   :  { %v1307_v6 = vpop.eup %1306  ;;  %1211 = vmatmul.msk.bf16.gmra.mxu3 %vm226_vm1, %v610_v43 }
0x1168   :  { %762 = vrot.lane.b32.xlu1 %v1307_v6, %s1513_s2 }
0x11da   :  { %v763_v45 = vpop.permute.xlu1 %762 }
0x11db   :  { %v765_v48 = vmul.f32 %v763_v45, %v760_v44 }
0x11dd   :  { %v1803_v49 = vadd.f32 %v766_v47, %v765_v48 }
0x11df   :  { %v768_v19 = vpack.c.bf16 %v1803_v49, %v1803_v49 }
0x11e1   :  { %770 = vrot.lane.b32.xlu2 %v768_v19, %s1513_s2 }
0x11ea   :  { %v653_v53 = vpop.f32.mrf.mxu3 }
0x11eb   :  { %v654_v54 = vadd.f32 %v1767_v46, %v653_v53 }
0x11f2   :  { %v655_v18 = vpop.f32.mrf.mxu3 }
0x11f3   :  { %v656_v21 = vadd.f32 %v1767_v46, %v655_v18 }
0x123b   :  { %v771_v42 = vpop.permute.xlu2 %770 }
0x123c   :  { %1223 = vmatmul.msk.bf16.vlgmr.msrb.gmra.mxu0 %vm226_vm1, %v771_v42 }
0x12b9   :  { %v784_v50 = vpop.f32.mrf.mxu0 }
0x12ba   :  { %v793_v51 = vadd.f32 %v784_v50, %v1761_v40  ;;  %v788_v55 = vadd.f32 %v784_v50, %v654_v54 }
0x12bc   :  { %795 = vrot.lane.b32.xlu1 %v793_v51, %s1506_s3  ;;  %v789_v57 = vmul.f32 0.5, %v788_v55 }
0x12be   :  { %1308 = vtanh.f32 %v789_v57  ;;  %v566_v57 = vadd.f32 %v1791_v23, %v1630_v9  ;;  %v210_v9 = vadd.f32 %v1634_v14, %v1677_v60 }
0x12c1   :  { %v786_v52 = vpop.f32.mrf.mxu0 }
0x12c4   :  { %v1309_v59 = vpop.eup %1308 }
0x12c5   :  { %v791_v58 = vadd.f32 1.0, %v1309_v59 }
0x12c7   :  { %v792_v61 = vmul.f32 0.5, %v791_v58 }
0x12c9   :  { %v805_v3 = vsub.f32 1.0, %v792_v61  ;;  %v811_v5 = vmul.f32 %v792_v61, %v1803_v49 }
0x132e   :  { %v796_v62 = vpop.permute.xlu1 %795 }
0x132f   :  { %v798_v63 = vmul.f32 %v796_v62, %v792_v61 }
0x1331   :  { %800 = vrot.lane.b32.xlu2 %v798_v63, %s1506_s3 }
0x138b   :  { %v801_v34 = vpop.permute.xlu2 %800 }
0x138c   :  { %v803_v0 = vadd.f32 %v801_v34, %v654_v54 }
0x138e   :  { %1310 = vtanh.f32 %v803_v0 }
0x1394   :  { %v1311_v2 = vpop.eup %1310 }
0x1395   :  { %807 = vrot.lane.b32.xlu0 %v1311_v2, %s1513_s2  ;;  %v561_v2 = vadd.f32 %v1791_v23, %v210_v9 }
0x1407   :  { %v808_v4 = vpop.permute.xlu0 %807 }
0x1408   :  { %v810_v10 = vmul.f32 %v808_v4, %v805_v3  ;;  %v562_v3 = vmul.f32 0.5, %v561_v2 }
0x140a   :  { %v1815_v11 = vadd.f32 %v811_v5, %v810_v10 }
0x140c   :  { %v813_v12 = vpack.c.bf16 %v1815_v11, %v1815_v11 }
0x140e   :  { %815 = vrot.lane.b32.xlu1 %v813_v12, %s1513_s2 }
0x1480   :  { %v816_v15 = vpop.permute.xlu1 %815 }
0x1481   :  { %1224 = vmatmul.msk.bf16.vlgmr.msrb.gmra.mxu1 %vm226_vm1, %v816_v15 }
0x14fe   :  { %v829_v16 = vpop.f32.mrf.mxu1 }
0x14ff   :  { %v838_v17 = vadd.f32 %v829_v16, %v1761_v40  ;;  %v833_v35 = vadd.f32 %v829_v16, %v656_v21 }
0x1501   :  { %840 = vrot.lane.b32.xlu2 %v838_v17, %s1506_s3  ;;  %v834_v22 = vmul.f32 0.5, %v833_v35 }
0x1503   :  { %1312 = vtanh.f32 %v834_v22 }
0x1506   :  { %v831_v7 = vpop.f32.mrf.mxu1 }
0x1509   :  { %v1313_v24 = vpop.eup %1312 }
0x150a   :  { %v836_v25 = vadd.f32 1.0, %v1313_v24 }
0x150c   :  { %v837_v31 = vmul.f32 0.5, %v836_v25 }
0x150e   :  { %v850_v30 = vsub.f32 1.0, %v837_v31  ;;  %v856_v32 = vmul.f32 %v837_v31, %v1815_v11 }
0x155b   :  { %v841_v56 = vpop.permute.xlu2 %840 }
0x155c   :  { %v843_v26 = vmul.f32 %v841_v56, %v837_v31 }
0x155e   :  { %845 = vrot.lane.b32.xlu0 %v843_v26, %s1506_s3 }
0x1566   :  { %611 = vrot.lane.b32.xlu0 %v588_v27, %s1513_s2 }
0x15d0   :  { %v846_v29 = vpop.permute.xlu0 %845 }
0x15d1   :  { %v848_v33 = vadd.f32 %v846_v29, %v656_v21 }
0x15d3   :  { %1314 = vtanh.f32 %v848_v33 }
0x15d8   :  { %v612_v36 = vpop.permute.xlu0 %611 }
0x15d9   :  { %v1315_v37 = vpop.eup %1314  ;;  %1212 = vmatmul.msk.bf16.gmra.mxu3 %vm226_vm1, %v612_v36 }
0x15da   :  { %852 = vrot.lane.b32.xlu1 %v1315_v37, %s1513_s2 }
0x164c   :  { %v853_v38 = vpop.permute.xlu1 %852 }
0x164d   :  { %v855_v39 = vmul.f32 %v853_v38, %v850_v30 }
0x164f   :  { %v1831_v8 = vadd.f32 %v856_v32, %v855_v39 }
0x1651   :  { %v858_v1 = vpack.c.bf16 %v1831_v8, %v1831_v8 }
0x1653   :  { %860 = vrot.lane.b32.xlu2 %v858_v1, %s1513_s2 }
0x165c   :  { %v658_v44 = vpop.f32.mrf.mxu3 }
0x165d   :  { %v659_v45 = vadd.f32 %v1767_v46, %v658_v44 }
0x1664   :  { %v660_v18 = vpop.f32.mrf.mxu3 }
0x1665   :  { %v661_v14 = vadd.f32 %v1767_v46, %v660_v18 }
0x16ad   :  { %v861_v28 = vpop.permute.xlu2 %860 }
0x16ae   :  { %1225 = vmatmul.msk.bf16.vlgmr.msrb.gmra.mxu2 %vm226_vm1, %v861_v28 }
0x1731   :  { %v874_v41 = vpop.f32.mrf.mxu2 }
0x1732   :  { %v883_v43 = vadd.f32 %v874_v41, %v1761_v40  ;;  %v878_v47 = vadd.f32 %v874_v41, %v659_v45 }
0x1734   :  { %885 = vrot.lane.b32.xlu1 %v883_v43, %s1506_s3  ;;  %v879_v48 = vmul.f32 0.5, %v878_v47 }
0x1736   :  { %1316 = vtanh.f32 %v879_v48 }
0x1739   :  { %v876_v6 = vpop.f32.mrf.mxu2 }
0x173c   :  { %v1317_v19 = vpop.eup %1316 }
0x173d   :  { %v881_v42 = vadd.f32 1.0, %v1317_v19 }
0x173f   :  { %v882_v50 = vmul.f32 0.5, %v881_v42 }
0x1741   :  { %v895_v59 = vsub.f32 1.0, %v882_v50  ;;  %v901_v61 = vmul.f32 %v882_v50, %v1831_v8 }
0x17a6   :  { %v886_v51 = vpop.permute.xlu1 %885 }
0x17a7   :  { %v888_v52 = vmul.f32 %v886_v51, %v882_v50 }
0x17a9   :  { %890 = vrot.lane.b32.xlu2 %v888_v52, %s1506_s3 }
0x1803   :  { %v891_v53 = vpop.permute.xlu2 %890 }
0x1804   :  { %v893_v54 = vadd.f32 %v891_v53, %v659_v45 }
0x1806   :  { %1318 = vtanh.f32 %v893_v54 }
0x1807   :  { %1320 = vtanh.f32 %v562_v3 }
0x180c   :  { %v1319_v55 = vpop.eup %1318 }
0x180d   :  { %897 = vrot.lane.b32.xlu0 %v1319_v55, %s1513_s2  ;;  %v1321_v4 = vpop.eup %1320 }
0x180e   :  { %v564_v12 = vadd.f32 1.0, %v1321_v4 }
0x1810   :  { %v565_v16 = vmul.f32 0.5, %v564_v12  ;;  %v1253_v12 = vld [vmem:[%s1960_s9 + $0x8] sm:$0xff] }
0x1811   :  { %1092 = vmatpush.bf16.msrb.mxu0 %v1253_v12 }
0x1812   :  { %v578_v36 = vsub.f32 1.0, %v565_v16  ;;  %v584_v30 = vmul.f32 %v565_v16, %v1775_v13 }
0x1815   :  { %568 = vrot.lane.b32.xlu0 %v566_v57, %s1506_s3 }
0x187f   :  { %v898_v58 = vpop.permute.xlu0 %897 }
0x1880   :  { %v900_v62 = vmul.f32 %v898_v58, %v895_v59 }
0x1882   :  { %v1846_v63 = vadd.f32 %v901_v61, %v900_v62 }
0x1884   :  { %v903_v34 = vpack.c.bf16 %v1846_v63, %v1846_v63 }
0x1886   :  { %905 = vrot.lane.b32.xlu1 %v903_v34, %s1513_s2 }
0x1887   :  { %v569_v15 = vpop.permute.xlu0 %568 }
0x1888   :  { %v571_v7 = vmul.f32 %v569_v15, %v565_v16  ;;  %v1252_v15 = vld [vmem:[%s1960_s9] sm:$0xff] }
0x1889   :  { %1093 = vmatpush.bf16.msrb.mxu0 %v1252_v15 }
0x18f8   :  { %v906_v0 = vpop.permute.xlu1 %905 }
0x18f9   :  { %1226 = vmatmul.msk.bf16.vlgmr.msra.gmra.mxu0 %vm226_vm1, %v906_v0 }
0x1976   :  { %v919_v5 = vpop.f32.mrf.mxu0 }
0x1977   :  { %v928_v10 = vadd.f32 %v919_v5, %v1761_v40  ;;  %v923_v60 = vadd.f32 %v919_v5, %v661_v14  ;;  %v1038_v5 = vpack.c.bf16 %v1803_v49, %v1780_v20  ;;  %v1895_v49 = vld [vmem:[%s1961_s10] ss:$0 sm:$0xff] }
0x1979   :  { %930 = vrot.lane.b32.xlu2 %v928_v10, %s1506_s3  ;;  %v924_v23 = vmul.f32 0.5, %v923_v60 }
0x197b   :  { %1322 = vtanh.f32 %v924_v23 }
0x197e   :  { %v921_v17 = vpop.f32.mrf.mxu0 }
0x1981   :  { %573 = vrot.lane.b32.xlu2 %v571_v7, %s1506_s3  ;;  %v1323_v21 = vpop.eup %1322 }
0x1982   :  { %v926_v35 = vadd.f32 1.0, %v1323_v21 }
0x1984   :  { %v927_v22 = vmul.f32 0.5, %v926_v35 }
0x1986   :  { %v940_v1 = vsub.f32 1.0, %v927_v22  ;;  %v946_v41 = vmul.f32 %v927_v22, %v1846_v63 }
0x19d3   :  { %v931_v24 = vpop.permute.xlu2 %930 }
0x19d4   :  { %v933_v25 = vmul.f32 %v931_v24, %v927_v22 }
0x19d6   :  { %935 = vrot.lane.b32.xlu1 %v933_v25, %s1506_s3 }
0x19db   :  { %v574_v31 = vpop.permute.xlu2 %573 }
0x19dc   :  { %v576_v56 = vadd.f32 %v574_v31, %v210_v9 }
0x19de   :  { %1324 = vtanh.f32 %v576_v56 }
0x19e4   :  { %v1325_v26 = vpop.eup %1324 }
0x19e5   :  { %580 = vrot.lane.b32.xlu1 %v1325_v26, %s1513_s2 }
0x1a48   :  { %v936_v27 = vpop.permute.xlu1 %935 }
0x1a49   :  { %v938_v29 = vadd.f32 %v936_v27, %v661_v14 }
0x1a4b   :  { %1326 = vtanh.f32 %v938_v29 }
0x1a51   :  { %v1327_v33 = vpop.eup %1326 }
0x1a52   :  { %942 = vrot.lane.b32.xlu0 %v1327_v33, %s1513_s2 }
0x1a57   :  { %v581_v37 = vpop.permute.xlu1 %580 }
0x1a58   :  { %v583_v38 = vmul.f32 %v581_v37, %v578_v36 }
0x1a5a   :  { %v585_v32 = vadd.f32 %v584_v30, %v583_v38 }
0x1a5c   :  { %v589_v39 = vpack.c.bf16 %v585_v32, %v1775_v13 }
0x1a5e   :  { %613 = vrot.lane.b32.xlu0 %v589_v39, %s1513_s2  ;;  %v1039_v39 = vpack.c.bf16 %v1831_v8, %v1815_v11 }
0x1ac4   :  { %v943_v28 = vpop.permute.xlu0 %942 }
0x1ac5   :  { %v945_v43 = vmul.f32 %v943_v28, %v940_v1 }
0x1ac7   :  { %v947_v6 = vadd.f32 %v946_v41, %v945_v43 }
0x1ac9   :  { %v948_v44 = vpack.c.bf16 %v947_v6, %v947_v6  ;;  %v1040_v10 = vpack.c.bf16 %v947_v6, %v1846_v63 }
0x1acb   :  { %950 = vrot.lane.b32.xlu2 %v948_v44, %s1513_s2 }
0x1ad0   :  { %v614_v45 = vpop.permute.xlu0 %613 }
0x1ad1   :  { %1213 = vmatmul.msk.bf16.gmra.mxu3 %vm226_vm1, %v614_v45 }
0x1b25   :  { %v951_v47 = vpop.permute.xlu2 %950 }
0x1b26   :  { %1227 = vmatmul.msk.bf16.vlgmr.msra.gmra.mxu1 %vm226_vm1, %v951_v47 }
0x1b54   :  { %v663_v42 = vpop.f32.mrf.mxu3 }
0x1b55   :  { %v664_v50 = vadd.f32 %v1767_v46, %v663_v42 }
0x1b5c   :  { %v665_v26 = vpop.f32.mrf.mxu3 }
0x1b5d   :  { %v666_v27 = vadd.f32 %v1767_v46, %v665_v26 }
0x1ba3   :  { %v964_v48 = vpop.f32.mrf.mxu1 }
0x1ba4   :  { %v973_v13 = vadd.f32 %v964_v48, %v1761_v40  ;;  %v968_v51 = vadd.f32 %v964_v48, %v664_v50 }
0x1ba6   :  { %975 = vrot.lane.b32.xlu1 %v973_v13, %s1506_s3  ;;  %v969_v52 = vmul.f32 0.5, %v968_v51 }
0x1ba8   :  { %1328 = vtanh.f32 %v969_v52 }
0x1bab   :  { %v966_v19 = vpop.f32.mrf.mxu1 }
0x1bae   :  { %v1329_v53 = vpop.eup %1328 }
0x1baf   :  { %v971_v54 = vadd.f32 1.0, %v1329_v53 }
0x1bb1   :  { %v972_v55 = vmul.f32 0.5, %v971_v54 }
0x1bb3   :  { %v985_v34 = vsub.f32 1.0, %v972_v55  ;;  %v991_v9 = vmul.f32 %v972_v55, %v947_v6 }
0x1c18   :  { %v976_v57 = vpop.permute.xlu1 %975 }
0x1c19   :  { %v978_v59 = vmul.f32 %v976_v57, %v972_v55 }
0x1c1b   :  { %980 = vrot.lane.b32.xlu2 %v978_v59, %s1506_s3 }
0x1c75   :  { %v981_v58 = vpop.permute.xlu2 %980 }
0x1c76   :  { %v983_v61 = vadd.f32 %v981_v58, %v664_v50 }
0x1c78   :  { %1330 = vtanh.f32 %v983_v61 }
0x1c7e   :  { %v1331_v62 = vpop.eup %1330 }
0x1c7f   :  { %987 = vrot.lane.b32.xlu0 %v1331_v62, %s1513_s2 }
0x1cf1   :  { %v988_v0 = vpop.permute.xlu0 %987 }
0x1cf2   :  { %v990_v2 = vmul.f32 %v988_v0, %v985_v34 }
0x1cf4   :  { %v1874_v3 = vadd.f32 %v991_v9, %v990_v2 }
0x1cf6   :  { %v993_v4 = vpack.c.bf16 %v1874_v3, %v1874_v3 }
0x1cf8   :  { %995 = vrot.lane.b32.xlu1 %v993_v4, %s1513_s2 }
0x1d00   :  { %1054 = vrot.lane.b32.xlu1 %v1038_v5, %s1513_s2 }
0x1d08   :  { %1058 = vrot.lane.b32.xlu1 %v1040_v10, %s1513_s2 }
0x1d6a   :  { %v996_v16 = vpop.permute.xlu1 %995 }
0x1d6b   :  { %1228 = vmatmul.msk.bf16.vlgmr.msra.gmra.mxu2 %vm226_vm1, %v996_v16 }
0x1d72   :  { %v1055_v20 = vpop.permute.xlu1 %1054 }
0x1d73   :  { %1237 = vmatmul.msk.bf16.vlgmr.msrb.gmra.mxu0 %vm226_vm1, %v1055_v20 }
0x1d7a   :  { %v1059_v43 = vpop.permute.xlu1 %1058 }
0x1dee   :  { %v1009_v63 = vpop.f32.mrf.mxu2 }
0x1def   :  { %v1018_v17 = vadd.f32 %v1009_v63, %v1761_v40  ;;  %v1013_v29 = vadd.f32 %v1009_v63, %v666_v27 }
0x1df0   :  { %v1095_v7 = vpop.f32.mrf.mxu0 }
0x1df1   :  { %v1096_v18 = vadd.f32 %v1895_v49, %v1095_v7  ;;  %1020 = vrot.lane.b32.xlu2 %v1018_v17, %s1506_s3  ;;  %v1014_v33 = vmul.f32 0.5, %v1013_v29 }
0x1df3   :  { %v1115_v14 = vmul.f32 0.5, %v1096_v18 }
0x1df5   :  { %1332 = vtanh.f32 %v1115_v14 }
0x1df6   :  { %v1011_v60 = vpop.f32.mrf.mxu2 }
0x1df8   :  { %v1097_v23 = vpop.f32.mrf.mxu0 }
0x1df9   :  { %v1098_v21 = vadd.f32 %v1895_v49, %v1097_v23 }
0x1dfb   :  { %v1333_v35 = vpop.eup %1332  ;;  %v1116_v22 = vmul.f32 0.5, %v1098_v21 }
0x1dfc   :  { %v1131_v24 = vadd.f32 1.0, %v1333_v35 }
0x1dfd   :  { %1334 = vtanh.f32 %v1116_v22 }
0x1dfe   :  { %v1139_v25 = vmul.f32 0.5, %v1131_v24  ;;  %1336 = vtanh.f32 %v1014_v33 }
0x1e00   :  { %1147 = vst.msk [vmem:[%s1962_s11] sm:$0xff] %vm226_vm1, %v1139_v25 }
0x1e03   :  { %v1335_v40 = vpop.eup %1334 }
0x1e04   :  { %v1132_v31 = vadd.f32 1.0, %v1335_v40  ;;  %v1337_v36 = vpop.eup %1336 }
0x1e05   :  { %v1016_v37 = vadd.f32 1.0, %v1337_v36 }
0x1e06   :  { %v1140_v56 = vmul.f32 0.5, %v1132_v31 }
0x1e07   :  { %v1017_v30 = vmul.f32 0.5, %v1016_v37 }
0x1e08   :  { %1148 = vst.msk [vmem:[%s1962_s11 + $0x8] sm:$0xff] %vm226_vm1, %v1140_v56 }
0x1e09   :  { %v1030_v6 = vsub.f32 1.0, %v1017_v30  ;;  %v1036_v45 = vmul.f32 %v1017_v30, %v1874_v3 }
0x1e4b   :  { %v1021_v38 = vpop.permute.xlu2 %1020 }
0x1e4c   :  { %v1023_v32 = vmul.f32 %v1021_v38, %v1017_v30 }
0x1e4e   :  { %1025 = vrot.lane.b32.xlu0 %v1023_v32, %s1506_s3 }
0x1e56   :  { %1056 = vrot.lane.b32.xlu0 %v1039_v39, %s1513_s2 }
0x1ec0   :  { %v1026_v1 = vpop.permute.xlu0 %1025 }
0x1ec1   :  { %v1028_v28 = vadd.f32 %v1026_v1, %v666_v27 }
0x1ec3   :  { %1338 = vtanh.f32 %v1028_v28 }
0x1ec8   :  { %v1057_v41 = vpop.permute.xlu0 %1056 }
0x1ec9   :  { %v1339_v46 = vpop.eup %1338  ;;  %1238 = vmatmul.msk.bf16.gmra.mxu0 %vm226_vm1, %v1057_v41 }
0x1eca   :  { %1032 = vrot.lane.b32.xlu2 %v1339_v46, %s1513_s2 }
0x1ed9   :  { %1239 = vmatmul.msk.bf16.gmra.mxu0 %vm226_vm1, %v1059_v43 }
0x1f24   :  { %v1033_v44 = vpop.permute.xlu2 %1032 }
0x1f25   :  { %v1035_v47 = vmul.f32 %v1033_v44, %v1030_v6 }
0x1f27   :  { %v1037_v11 = vadd.f32 %v1036_v45, %v1035_v47 }
0x1f29   :  { %v1041_v8 = vpack.c.bf16 %v1037_v11, %v1874_v3 }
0x1f2b   :  { %1060 = vrot.lane.b32.xlu2 %v1041_v8, %s1513_s2 }
0x1f46   :  { %v1100_v48 = vpop.f32.mrf.mxu0 }
0x1f47   :  { %v1101_v13 = vadd.f32 %v1895_v49, %v1100_v48 }
0x1f49   :  { %v1117_v19 = vmul.f32 0.5, %v1101_v13 }
0x1f4b   :  { %1340 = vtanh.f32 %v1117_v19 }
0x1f4e   :  { %v1102_v42 = vpop.f32.mrf.mxu0 }
0x1f4f   :  { %v1103_v50 = vadd.f32 %v1895_v49, %v1102_v42 }
0x1f51   :  { %v1341_v51 = vpop.eup %1340  ;;  %v1118_v52 = vmul.f32 0.5, %v1103_v50 }
0x1f52   :  { %v1133_v53 = vadd.f32 1.0, %v1341_v51 }
0x1f53   :  { %1342 = vtanh.f32 %v1118_v52 }
0x1f54   :  { %v1141_v54 = vmul.f32 0.5, %v1133_v53 }
0x1f56   :  { %1149 = vst.msk [vmem:[%s1962_s11 + $0x10] sm:$0xff] %vm226_vm1, %v1141_v54  ;;  %v1105_v55 = vpop.f32.mrf.mxu0 }
0x1f57   :  { %v1106_v57 = vadd.f32 %v1895_v49, %v1105_v55 }
0x1f59   :  { %v1343_v59 = vpop.eup %1342  ;;  %v1119_v58 = vmul.f32 0.5, %v1106_v57 }
0x1f5a   :  { %v1134_v61 = vadd.f32 1.0, %v1343_v59 }
0x1f5b   :  { %1344 = vtanh.f32 %v1119_v58 }
0x1f5c   :  { %v1142_v62 = vmul.f32 0.5, %v1134_v61 }
0x1f5e   :  { %1150 = vst.msk [vmem:[%s1962_s11 + $0x18] sm:$0xff] %vm226_vm1, %v1142_v62  ;;  %v1107_v34 = vpop.f32.mrf.mxu0 }
0x1f5f   :  { %v1108_v0 = vadd.f32 %v1895_v49, %v1107_v34 }
0x1f61   :  { %v1345_v9 = vpop.eup %1344  ;;  %v1120_v2 = vmul.f32 0.5, %v1108_v0 }
0x1f62   :  { %v1135_v3 = vadd.f32 1.0, %v1345_v9 }
0x1f63   :  { %1346 = vtanh.f32 %v1120_v2 }
0x1f64   :  { %v1143_v4 = vmul.f32 0.5, %v1135_v3 }
0x1f66   :  { %1151 = vst.msk [vmem:[%s1962_s11 + $0x20] sm:$0xff] %vm226_vm1, %v1143_v4 }
0x1f69   :  { %v1347_v5 = vpop.eup %1346 }
0x1f6a   :  { %v1136_v10 = vadd.f32 1.0, %v1347_v5 }
0x1f6c   :  { %v1144_v12 = vmul.f32 0.5, %v1136_v10 }
0x1f6e   :  { %1152 = vst.msk [vmem:[%s1962_s11 + $0x28] sm:$0xff] %vm226_vm1, %v1144_v12 }
0x1f85   :  { %v1061_v15 = vpop.permute.xlu2 %1060 }
0x1f86   :  { %1240 = vmatmul.msk.bf16.gmra.mxu0 %vm226_vm1, %v1061_v15 }
0x2003   :  { %v1110_v16 = vpop.f32.mrf.mxu0 }
0x2004   :  { %v1111_v20 = vadd.f32 %v1895_v49, %v1110_v16 }
0x2006   :  { %v1121_v63 = vmul.f32 0.5, %v1111_v20 }
0x2008   :  { %1348 = vtanh.f32 %v1121_v63 }
0x200b   :  { %v1112_v17 = vpop.f32.mrf.mxu0 }
0x200c   :  { %v1113_v7 = vadd.f32 %v1895_v49, %v1112_v17 }
0x200e   :  { %v1349_v18 = vpop.eup %1348  ;;  %v1122_v14 = vmul.f32 0.5, %v1113_v7 }
0x200f   :  { %v1137_v60 = vadd.f32 1.0, %v1349_v18 }
0x2010   :  { %1350 = vtanh.f32 %v1122_v14 }
0x2011   :  { %v1145_v23 = vmul.f32 0.5, %v1137_v60 }
0x2013   :  { %1153 = vst.msk [vmem:[%s1962_s11 + $0x30] sm:$0xff] %vm226_vm1, %v1145_v23 }
0x2016   :  { %v1351_v21 = vpop.eup %1350 }
0x2017   :  { %v1138_v35 = vadd.f32 1.0, %v1351_v21 }
0x2019   :  { %v1146_v22 = vmul.f32 0.5, %v1138_v35 }
0x201b   :  { %1154 = vst.msk [vmem:[%s1962_s11 + $0x38] sm:$0xff] %vm226_vm1, %v1146_v22 }
0x201c   :  { %1159 = vsyncpa [#allocation3], 1 }
0x201d   :  { %1160 = vsyncpa [#allocation5], 1 }
0x201e   :  { %1161 = vsyncpa [#allocation8], 1 }
0x201f   :  { %1162 = vsyncpa [#allocation11], 1 }

</bundles_post_ra>
